<compile_context>
chip_gen: v6e
topology: v6e:2x2x1
jax: 0.10.0
libtpu: 0.0.40
codegen_flags: <defaults>
</compile_context>

<pallas_src>
import numpy as np
import jax
import jax.numpy as jnp
from jax import lax
from jax.experimental import pallas as pl
from jax.experimental.pallas import tpu as pltpu

LEAKY_SLOPE = 0.01   # nn.LeakyReLU default
BN_EPS = 1e-5        # nn.BatchNorm1d default
L1 = 14              # conv1 output length: (240 - 32)//16 + 1
T2 = 4               # conv2 output length: (14 - 8)//2 + 1  (view(-1,48) => 12*4 == 48)


def _disc_kernel(n_batch):
    """Fused Discriminator forward for a fixed batch size.

    Refs (all VMEM resident):
      xp    : (14*N, 96)   bf16  im2col conv1 patches, rows ordered (time, batch)
      w1    : (96, 240)    bf16  block-diagonal grouped conv1 weight
      gamma : (1, 240)     f32   BatchNorm weight
      beta  : (1, 240)     f32   BatchNorm bias
      wcomb : (14, 240, 24) bf16 conv2 o view(-1,48) o Linear(48->24) folded weight
      wl2   : (24, 2)      bf16  Linear(24->2) weight (transposed)
      out   : (N, 2)       f32
    """

    def kernel(xp_ref, w1_ref, gamma_ref, beta_ref, wcomb_ref, wl2_ref, out_ref):
        # ---- conv1: grouped Conv1d(3->240, k=32, s=16, groups=3) as one bf16 matmul ----
        y = jnp.dot(xp_ref[...], w1_ref[...],
                    preferred_element_type=jnp.float32)            # (14N, 240) f32

        # ---- LeakyReLU (f32 on the VPU) ----
        y = jnp.where(y > 0, y, LEAKY_SLOPE * y)

        # ---- BatchNorm1d(240), training-mode batch stats over (batch, time) ----
        # Single pass: mean and E[x^2], var = E[x^2] - mean^2 (biased, matches PyTorch).
        rows = y.shape[0]
        inv_r = 1.0 / rows
        mean = jnp.sum(y, axis=0, keepdims=True) * inv_r            # (1, 240)
        ex2 = jnp.sum(y * y, axis=0, keepdims=True) * inv_r
        var = ex2 - mean * mean
        scale = lax.rsqrt(var + BN_EPS) * gamma_ref[...]            # (1, 240)
        shift = beta_ref[...] - mean * scale
        # Cast to bf16 only at the MXU boundary; stats/normalize stayed f32.
        yb = (y * scale + shift).astype(jnp.bfloat16)               # (14N, 240) bf16

        # ---- conv2(240->12,k=8,s=2) o view(-1,48) o Linear(48->24): folded into Wcomb ----
        # Rows of yb are ordered (time m, batch b), so time block m is a contiguous slice.
        h = jnp.zeros((n_batch, 24), jnp.float32)
        for m in range(L1):
            h = h + jnp.dot(yb[m * n_batch:(m + 1) * n_batch, :], wcomb_ref[m],
                            preferred_element_type=jnp.float32)     # (N, 24)
        h = jnp.maximum(h, 0.0)                                      # ReLU

        # ---- Linear(24->2, no bias) + Sigmoid ----
        logits = jnp.dot(h.astype(jnp.bfloat16), wl2_ref[...],
                         preferred_element_type=jnp.float32)         # (N, 2)
        out_ref[...] = jax.nn.sigmoid(logits)

    return kernel


def prepare_params(params):
    """One-time host-side (numpy) parameter glue -> kernel-ready bf16/f32 device arrays."""
    W1 = np.asarray(params["W1"], np.float32)    # (240, 1, 32)  grouped conv1
    W2 = np.asarray(params["W2"], np.float32)    # (12, 240, 8)  conv2
    gamma = np.asarray(params["gamma"], np.float32)
    beta = np.asarray(params["beta"], np.float32)
    Wl1 = np.asarray(params["Wl1"], np.float32)  # (24, 48)
    Wl2 = np.asarray(params["Wl2"], np.float32)  # (2, 24)

    # Block-diagonal grouped conv1 weight: w1bd[g*32 + tau, c] = W1[c, 0, tau], c in group g.
    w1bd = np.zeros((96, 240), np.float32)
    for g in range(3):
        w1bd[g * 32:(g + 1) * 32, g * 80:(g + 1) * 80] = W1[g * 80:(g + 1) * 80, 0, :].T

    # Fold conv2 + channel-major view(-1,48) + Linear(48->24) into one weight:
    #   Wcomb[m, c, j] = sum_{t,k: 2t+k = m} sum_o W2[o, c, k] * Wl1[j, o*4 + t]
    wcomb = np.zeros((L1, 240, 24), np.float32)
    for t in range(T2):
        wl1_t = Wl1[:, t::4]                      # (24, 12) : Wl1[j, o*4 + t]
        for k in range(8):
            wcomb[2 * t + k] += W2[:, :, k].T @ wl1_t.T    # (240, 24)

    return dict(
        w1bd=jnp.asarray(w1bd, jnp.bfloat16),
        gamma=jnp.asarray(gamma.reshape(1, 240), jnp.float32),
        beta=jnp.asarray(beta.reshape(1, 240), jnp.float32),
        wcomb=jnp.asarray(wcomb, jnp.bfloat16),
        wl2=jnp.asarray(Wl2.T, jnp.bfloat16),     # (24, 2)
    )


def discriminator_forward(x, prep):
    """x: (N, 3, 240) float32 (NCL, same as PyTorch). prep: output of prepare_params."""
    n, cin, L = x.shape
    assert cin == 3 and L == 240, "Discriminator expects (N, 3, 240) input"

    # im2col for conv1 (stride 16, K=32 -> each patch = two adjacent 16-chunks),
    # rows ordered (time, batch): xp[t*n + b, g*32 + tau] = x[b, g, 16*t + tau].
    xr = x.reshape(n, 3, 15, 16)
    patches = jnp.concatenate([xr[:, :, :14, :], xr[:, :, 1:, :]], axis=-1)   # (n,3,14,32)
    xp = jnp.transpose(patches, (2, 0, 1, 3)).reshape(L1 * n, 96)
    xp = xp.astype(jnp.bfloat16)   # cast activations at the MXU boundary (halves DMA bytes)

    vmem = pl.BlockSpec(memory_space=pltpu.MemorySpace.VMEM)
    return pl.pallas_call(
        _disc_kernel(n),
        out_shape=jax.ShapeDtypeStruct((n, 2), jnp.float32),
        in_specs=[vmem] * 6,
        out_specs=vmem,
    )(xp, prep["w1bd"], prep["gamma"], prep["beta"], prep["wcomb"], prep["wl2"])


def reference_forward(x, params):
    """Pure-JAX/XLA reference mirroring the PyTorch forward (train-mode BatchNorm)."""
    W1, W2 = params["W1"], params["W2"]
    gamma, beta = params["gamma"], params["beta"]
    Wl1, Wl2 = params["Wl1"], params["Wl2"]

    dn1 = lax.conv_dimension_numbers(x.shape, W1.shape, ("NCH", "OIH", "NCH"))
    y = lax.conv_general_dilated(x, W1, (16,), "VALID", dimension_numbers=dn1,
                                 feature_group_count=3, precision=lax.Precision.HIGHEST)
    y = jnp.where(y > 0, y, LEAKY_SLOPE * y)
    mean = y.mean(axis=(0, 2), keepdims=True)
    var = jnp.square(y - mean).mean(axis=(0, 2), keepdims=True)
    y = (y - mean) / jnp.sqrt(var + BN_EPS) * gamma[None, :, None] + beta[None, :, None]

    dn2 = lax.conv_dimension_numbers(y.shape, W2.shape, ("NCH", "OIH", "NCH"))
    z = lax.conv_general_dilated(y, W2, (2,), "VALID", dimension_numbers=dn2,
                                 precision=lax.Precision.HIGHEST)
    z = z.reshape(-1, 48)
    h = jnp.maximum(jnp.dot(z, Wl1.T, precision=lax.Precision.HIGHEST), 0.0)
    return jax.nn.sigmoid(jnp.dot(h, Wl2.T, precision=lax.Precision.HIGHEST))


if __name__ == "__main__":
    key = jax.random.PRNGKey(0)
    k_x, k_w1, k_w2, k_l1, k_l2, k_g, k_b = jax.random.split(key, 7)

    # Input: batch=2, channels=3 (forced by groups=3), length=240 (so that view(-1,48) is
    # the per-sample flatten of the (12, 4) encoder output).
    x = jax.random.normal(k_x, (2, 3, 240), dtype=jnp.float32)

    # Deterministic synthetic parameters (shapes from the module's __init__).
    params = dict(
        W1=0.05 * jax.random.normal(k_w1, (240, 1, 32), dtype=jnp.float32),  # grouped conv1
        W2=0.02 * jax.random.normal(k_w2, (12, 240, 8), dtype=jnp.float32),  # conv2
        gamma=1.0 + 0.1 * jax.random.normal(k_g, (240,), dtype=jnp.float32),  # BN weight
        beta=0.1 * jax.random.normal(k_b, (240,), dtype=jnp.float32),         # BN bias
        Wl1=0.1 * jax.random.normal(k_l1, (24, 48), dtype=jnp.float32),       # Linear 48->24
        Wl2=0.2 * jax.random.normal(k_l2, (2, 24), dtype=jnp.float32),        # Linear 24->2
    )

    prep = prepare_params(params)                 # one-time numpy glue (outside hot path)
    fwd = jax.jit(discriminator_forward)

    out = fwd(x, prep)
    jax.block_until_ready(out)
    assert out.shape == (2, 2)

    ref = reference_forward(x, params)
    max_diff = float(jnp.max(jnp.abs(out - ref)))
    assert max_diff < 2e-2, f"kernel/reference mismatch: max|diff|={max_diff}"

    print("KERNEL_OK")
</pallas_src>

<mosaic_0001>
module attributes {stable_mosaic.version = 11 : i64} {
  func.func @kernel(%arg0: memref<28x96xbf16, #tpu.memory_space<vmem>>, %arg1: memref<96x240xbf16, #tpu.memory_space<vmem>>, %arg2: memref<1x240xf32, #tpu.memory_space<vmem>>, %arg3: memref<1x240xf32, #tpu.memory_space<vmem>>, %arg4: memref<14x240x24xbf16, #tpu.memory_space<vmem>>, %arg5: memref<24x2xbf16, #tpu.memory_space<vmem>>, %arg6: memref<2x2xf32, #tpu.memory_space<vmem>>) attributes {dimension_semantics = [], scalar_prefetch = 0 : i64, scratch_operands = 0 : i64, tpu.core_type = #tpu.core_type<tc>} {
    %c0 = arith.constant 0 : index
    %c0_0 = arith.constant 0 : index
    %0 = vector.load %arg0[%c0, %c0_0] : memref<28x96xbf16, #tpu.memory_space<vmem>>, vector<28x96xbf16>
    %c0_1 = arith.constant 0 : index
    %c0_2 = arith.constant 0 : index
    %1 = vector.load %arg1[%c0_1, %c0_2] : memref<96x240xbf16, #tpu.memory_space<vmem>>, vector<96x240xbf16>
    %cst = arith.constant dense<0.000000e+00> : vector<28x240xf32>
    %2 = tpu.matmul %0, %1, %cst {dimension_numbers = #tpu.dot_dimension_numbers<[1], [0], [0], [1], [0, 0, 1, 1], [], []>} : vector<28x96xbf16>, vector<96x240xbf16>, vector<28x240xf32> -> vector<28x240xf32>
    %cst_3 = arith.constant 0.000000e+00 : f32
    %3 = vector.broadcast %cst_3 : f32 to vector<28x240xf32>
    %4 = arith.cmpf ogt, %2, %3 : vector<28x240xf32>
    %cst_4 = arith.constant 0.00999999977 : f32
    %5 = vector.broadcast %cst_4 : f32 to vector<28x240xf32>
    %6 = arith.mulf %5, %2 : vector<28x240xf32>
    %7 = arith.select %4, %2, %6 : vector<28x240xi1>, vector<28x240xf32>
    %cst_5 = arith.constant dense<0.000000e+00> : vector<240xf32>
    %8 = vector.multi_reduction <add>, %7, %cst_5 [0] : vector<28x240xf32> to vector<240xf32>
    %9 = vector.shape_cast %8 : vector<240xf32> to vector<1x240xf32>
    %cst_6 = arith.constant 0.0357142873 : f32
    %10 = vector.broadcast %cst_6 : f32 to vector<1x240xf32>
    %11 = arith.mulf %9, %10 : vector<1x240xf32>
    %12 = arith.mulf %7, %7 : vector<28x240xf32>
    %cst_7 = arith.constant dense<0.000000e+00> : vector<240xf32>
    %13 = vector.multi_reduction <add>, %12, %cst_7 [0] : vector<28x240xf32> to vector<240xf32>
    %14 = vector.shape_cast %13 : vector<240xf32> to vector<1x240xf32>
    %cst_8 = arith.constant 0.0357142873 : f32
    %15 = vector.broadcast %cst_8 : f32 to vector<1x240xf32>
    %16 = arith.mulf %14, %15 : vector<1x240xf32>
    %17 = arith.mulf %11, %11 : vector<1x240xf32>
    %18 = arith.subf %16, %17 : vector<1x240xf32>
    %cst_9 = arith.constant 9.99999974E-6 : f32
    %19 = vector.broadcast %cst_9 : f32 to vector<1x240xf32>
    %20 = arith.addf %18, %19 : vector<1x240xf32>
    %21 = math.rsqrt %20 : vector<1x240xf32>
    %c0_10 = arith.constant 0 : index
    %c0_11 = arith.constant 0 : index
    %22 = vector.load %arg2[%c0_10, %c0_11] : memref<1x240xf32, #tpu.memory_space<vmem>>, vector<1x240xf32>
    %23 = arith.mulf %21, %22 : vector<1x240xf32>
    %c0_12 = arith.constant 0 : index
    %c0_13 = arith.constant 0 : index
    %24 = vector.load %arg3[%c0_12, %c0_13] : memref<1x240xf32, #tpu.memory_space<vmem>>, vector<1x240xf32>
    %25 = arith.mulf %11, %23 : vector<1x240xf32>
    %26 = arith.subf %24, %25 : vector<1x240xf32>
    %27 = vector.broadcast %23 : vector<1x240xf32> to vector<28x240xf32>
    %28 = arith.mulf %7, %27 : vector<28x240xf32>
    %29 = vector.broadcast %26 : vector<1x240xf32> to vector<28x240xf32>
    %30 = arith.addf %28, %29 : vector<28x240xf32>
    %31 = arith.truncf %30 : vector<28x240xf32> to vector<28x240xbf16>
    %cst_14 = arith.constant 0.000000e+00 : f32
    %32 = vector.broadcast %cst_14 : f32 to vector<2x24xf32>
    %33 = vector.extract_strided_slice %31 {offsets = [0, 0], sizes = [2, 240], strides = [1, 1]} : vector<28x240xbf16> to vector<2x240xbf16>
    %c0_15 = arith.constant 0 : index
    %c0_16 = arith.constant 0 : index
    %c0_17 = arith.constant 0 : index
    %34 = vector.load %arg4[%c0_15, %c0_16, %c0_17] : memref<14x240x24xbf16, #tpu.memory_space<vmem>>, vector<1x240x24xbf16>
    %35 = vector.shape_cast %34 : vector<1x240x24xbf16> to vector<240x24xbf16>
    %cst_18 = arith.constant dense<0.000000e+00> : vector<2x24xf32>
    %36 = tpu.matmul %33, %35, %cst_18 {dimension_numbers = #tpu.dot_dimension_numbers<[1], [0], [0], [1], [0, 0, 1, 1], [], []>} : vector<2x240xbf16>, vector<240x24xbf16>, vector<2x24xf32> -> vector<2x24xf32>
    %37 = arith.addf %32, %36 : vector<2x24xf32>
    %38 = vector.extract_strided_slice %31 {offsets = [2, 0], sizes = [2, 240], strides = [1, 1]} : vector<28x240xbf16> to vector<2x240xbf16>
    %c1 = arith.constant 1 : index
    %c0_19 = arith.constant 0 : index
    %c0_20 = arith.constant 0 : index
    %39 = vector.load %arg4[%c1, %c0_19, %c0_20] : memref<14x240x24xbf16, #tpu.memory_space<vmem>>, vector<1x240x24xbf16>
    %40 = vector.shape_cast %39 : vector<1x240x24xbf16> to vector<240x24xbf16>
    %cst_21 = arith.constant dense<0.000000e+00> : vector<2x24xf32>
    %41 = tpu.matmul %38, %40, %cst_21 {dimension_numbers = #tpu.dot_dimension_numbers<[1], [0], [0], [1], [0, 0, 1, 1], [], []>} : vector<2x240xbf16>, vector<240x24xbf16>, vector<2x24xf32> -> vector<2x24xf32>
    %42 = arith.addf %37, %41 : vector<2x24xf32>
    %43 = vector.extract_strided_slice %31 {offsets = [4, 0], sizes = [2, 240], strides = [1, 1]} : vector<28x240xbf16> to vector<2x240xbf16>
    %c2 = arith.constant 2 : index
    %c0_22 = arith.constant 0 : index
    %c0_23 = arith.constant 0 : index
    %44 = vector.load %arg4[%c2, %c0_22, %c0_23] : memref<14x240x24xbf16, #tpu.memory_space<vmem>>, vector<1x240x24xbf16>
    %45 = vector.shape_cast %44 : vector<1x240x24xbf16> to vector<240x24xbf16>
    %cst_24 = arith.constant dense<0.000000e+00> : vector<2x24xf32>
    %46 = tpu.matmul %43, %45, %cst_24 {dimension_numbers = #tpu.dot_dimension_numbers<[1], [0], [0], [1], [0, 0, 1, 1], [], []>} : vector<2x240xbf16>, vector<240x24xbf16>, vector<2x24xf32> -> vector<2x24xf32>
    %47 = arith.addf %42, %46 : vector<2x24xf32>
    %48 = vector.extract_strided_slice %31 {offsets = [6, 0], sizes = [2, 240], strides = [1, 1]} : vector<28x240xbf16> to vector<2x240xbf16>
    %c3 = arith.constant 3 : index
    %c0_25 = arith.constant 0 : index
    %c0_26 = arith.constant 0 : index
    %49 = vector.load %arg4[%c3, %c0_25, %c0_26] : memref<14x240x24xbf16, #tpu.memory_space<vmem>>, vector<1x240x24xbf16>
    %50 = vector.shape_cast %49 : vector<1x240x24xbf16> to vector<240x24xbf16>
    %cst_27 = arith.constant dense<0.000000e+00> : vector<2x24xf32>
    %51 = tpu.matmul %48, %50, %cst_27 {dimension_numbers = #tpu.dot_dimension_numbers<[1], [0], [0], [1], [0, 0, 1, 1], [], []>} : vector<2x240xbf16>, vector<240x24xbf16>, vector<2x24xf32> -> vector<2x24xf32>
    %52 = arith.addf %47, %51 : vector<2x24xf32>
    %53 = vector.extract_strided_slice %31 {offsets = [8, 0], sizes = [2, 240], strides = [1, 1]} : vector<28x240xbf16> to vector<2x240xbf16>
    %c4 = arith.constant 4 : index
    %c0_28 = arith.constant 0 : index
    %c0_29 = arith.constant 0 : index
    %54 = vector.load %arg4[%c4, %c0_28, %c0_29] : memref<14x240x24xbf16, #tpu.memory_space<vmem>>, vector<1x240x24xbf16>
    %55 = vector.shape_cast %54 : vector<1x240x24xbf16> to vector<240x24xbf16>
    %cst_30 = arith.constant dense<0.000000e+00> : vector<2x24xf32>
    %56 = tpu.matmul %53, %55, %cst_30 {dimension_numbers = #tpu.dot_dimension_numbers<[1], [0], [0], [1], [0, 0, 1, 1], [], []>} : vector<2x240xbf16>, vector<240x24xbf16>, vector<2x24xf32> -> vector<2x24xf32>
    %57 = arith.addf %52, %56 : vector<2x24xf32>
    %58 = vector.extract_strided_slice %31 {offsets = [10, 0], sizes = [2, 240], strides = [1, 1]} : vector<28x240xbf16> to vector<2x240xbf16>
    %c5 = arith.constant 5 : index
    %c0_31 = arith.constant 0 : index
    %c0_32 = arith.constant 0 : index
    %59 = vector.load %arg4[%c5, %c0_31, %c0_32] : memref<14x240x24xbf16, #tpu.memory_space<vmem>>, vector<1x240x24xbf16>
    %60 = vector.shape_cast %59 : vector<1x240x24xbf16> to vector<240x24xbf16>
    %cst_33 = arith.constant dense<0.000000e+00> : vector<2x24xf32>
    %61 = tpu.matmul %58, %60, %cst_33 {dimension_numbers = #tpu.dot_dimension_numbers<[1], [0], [0], [1], [0, 0, 1, 1], [], []>} : vector<2x240xbf16>, vector<240x24xbf16>, vector<2x24xf32> -> vector<2x24xf32>
    %62 = arith.addf %57, %61 : vector<2x24xf32>
    %63 = vector.extract_strided_slice %31 {offsets = [12, 0], sizes = [2, 240], strides = [1, 1]} : vector<28x240xbf16> to vector<2x240xbf16>
    %c6 = arith.constant 6 : index
    %c0_34 = arith.constant 0 : index
    %c0_35 = arith.constant 0 : index
    %64 = vector.load %arg4[%c6, %c0_34, %c0_35] : memref<14x240x24xbf16, #tpu.memory_space<vmem>>, vector<1x240x24xbf16>
    %65 = vector.shape_cast %64 : vector<1x240x24xbf16> to vector<240x24xbf16>
    %cst_36 = arith.constant dense<0.000000e+00> : vector<2x24xf32>
    %66 = tpu.matmul %63, %65, %cst_36 {dimension_numbers = #tpu.dot_dimension_numbers<[1], [0], [0], [1], [0, 0, 1, 1], [], []>} : vector<2x240xbf16>, vector<240x24xbf16>, vector<2x24xf32> -> vector<2x24xf32>
    %67 = arith.addf %62, %66 : vector<2x24xf32>
    %68 = vector.extract_strided_slice %31 {offsets = [14, 0], sizes = [2, 240], strides = [1, 1]} : vector<28x240xbf16> to vector<2x240xbf16>
    %c7 = arith.constant 7 : index
    %c0_37 = arith.constant 0 : index
    %c0_38 = arith.constant 0 : index
    %69 = vector.load %arg4[%c7, %c0_37, %c0_38] : memref<14x240x24xbf16, #tpu.memory_space<vmem>>, vector<1x240x24xbf16>
    %70 = vector.shape_cast %69 : vector<1x240x24xbf16> to vector<240x24xbf16>
    %cst_39 = arith.constant dense<0.000000e+00> : vector<2x24xf32>
    %71 = tpu.matmul %68, %70, %cst_39 {dimension_numbers = #tpu.dot_dimension_numbers<[1], [0], [0], [1], [0, 0, 1, 1], [], []>} : vector<2x240xbf16>, vector<240x24xbf16>, vector<2x24xf32> -> vector<2x24xf32>
    %72 = arith.addf %67, %71 : vector<2x24xf32>
    %73 = vector.extract_strided_slice %31 {offsets = [16, 0], sizes = [2, 240], strides = [1, 1]} : vector<28x240xbf16> to vector<2x240xbf16>
    %c8 = arith.constant 8 : index
    %c0_40 = arith.constant 0 : index
    %c0_41 = arith.constant 0 : index
    %74 = vector.load %arg4[%c8, %c0_40, %c0_41] : memref<14x240x24xbf16, #tpu.memory_space<vmem>>, vector<1x240x24xbf16>
    %75 = vector.shape_cast %74 : vector<1x240x24xbf16> to vector<240x24xbf16>
    %cst_42 = arith.constant dense<0.000000e+00> : vector<2x24xf32>
    %76 = tpu.matmul %73, %75, %cst_42 {dimension_numbers = #tpu.dot_dimension_numbers<[1], [0], [0], [1], [0, 0, 1, 1], [], []>} : vector<2x240xbf16>, vector<240x24xbf16>, vector<2x24xf32> -> vector<2x24xf32>
    %77 = arith.addf %72, %76 : vector<2x24xf32>
    %78 = vector.extract_strided_slice %31 {offsets = [18, 0], sizes = [2, 240], strides = [1, 1]} : vector<28x240xbf16> to vector<2x240xbf16>
    %c9 = arith.constant 9 : index
    %c0_43 = arith.constant 0 : index
    %c0_44 = arith.constant 0 : index
    %79 = vector.load %arg4[%c9, %c0_43, %c0_44] : memref<14x240x24xbf16, #tpu.memory_space<vmem>>, vector<1x240x24xbf16>
    %80 = vector.shape_cast %79 : vector<1x240x24xbf16> to vector<240x24xbf16>
    %cst_45 = arith.constant dense<0.000000e+00> : vector<2x24xf32>
    %81 = tpu.matmul %78, %80, %cst_45 {dimension_numbers = #tpu.dot_dimension_numbers<[1], [0], [0], [1], [0, 0, 1, 1], [], []>} : vector<2x240xbf16>, vector<240x24xbf16>, vector<2x24xf32> -> vector<2x24xf32>
    %82 = arith.addf %77, %81 : vector<2x24xf32>
    %83 = vector.extract_strided_slice %31 {offsets = [20, 0], sizes = [2, 240], strides = [1, 1]} : vector<28x240xbf16> to vector<2x240xbf16>
    %c10 = arith.constant 10 : index
    %c0_46 = arith.constant 0 : index
    %c0_47 = arith.constant 0 : index
    %84 = vector.load %arg4[%c10, %c0_46, %c0_47] : memref<14x240x24xbf16, #tpu.memory_space<vmem>>, vector<1x240x24xbf16>
    %85 = vector.shape_cast %84 : vector<1x240x24xbf16> to vector<240x24xbf16>
    %cst_48 = arith.constant dense<0.000000e+00> : vector<2x24xf32>
    %86 = tpu.matmul %83, %85, %cst_48 {dimension_numbers = #tpu.dot_dimension_numbers<[1], [0], [0], [1], [0, 0, 1, 1], [], []>} : vector<2x240xbf16>, vector<240x24xbf16>, vector<2x24xf32> -> vector<2x24xf32>
    %87 = arith.addf %82, %86 : vector<2x24xf32>
    %88 = vector.extract_strided_slice %31 {offsets = [22, 0], sizes = [2, 240], strides = [1, 1]} : vector<28x240xbf16> to vector<2x240xbf16>
    %c11 = arith.constant 11 : index
    %c0_49 = arith.constant 0 : index
    %c0_50 = arith.constant 0 : index
    %89 = vector.load %arg4[%c11, %c0_49, %c0_50] : memref<14x240x24xbf16, #tpu.memory_space<vmem>>, vector<1x240x24xbf16>
    %90 = vector.shape_cast %89 : vector<1x240x24xbf16> to vector<240x24xbf16>
    %cst_51 = arith.constant dense<0.000000e+00> : vector<2x24xf32>
    %91 = tpu.matmul %88, %90, %cst_51 {dimension_numbers = #tpu.dot_dimension_numbers<[1], [0], [0], [1], [0, 0, 1, 1], [], []>} : vector<2x240xbf16>, vector<240x24xbf16>, vector<2x24xf32> -> vector<2x24xf32>
    %92 = arith.addf %87, %91 : vector<2x24xf32>
    %93 = vector.extract_strided_slice %31 {offsets = [24, 0], sizes = [2, 240], strides = [1, 1]} : vector<28x240xbf16> to vector<2x240xbf16>
    %c12 = arith.constant 12 : index
    %c0_52 = arith.constant 0 : index
    %c0_53 = arith.constant 0 : index
    %94 = vector.load %arg4[%c12, %c0_52, %c0_53] : memref<14x240x24xbf16, #tpu.memory_space<vmem>>, vector<1x240x24xbf16>
    %95 = vector.shape_cast %94 : vector<1x240x24xbf16> to vector<240x24xbf16>
    %cst_54 = arith.constant dense<0.000000e+00> : vector<2x24xf32>
    %96 = tpu.matmul %93, %95, %cst_54 {dimension_numbers = #tpu.dot_dimension_numbers<[1], [0], [0], [1], [0, 0, 1, 1], [], []>} : vector<2x240xbf16>, vector<240x24xbf16>, vector<2x24xf32> -> vector<2x24xf32>
    %97 = arith.addf %92, %96 : vector<2x24xf32>
    %98 = vector.extract_strided_slice %31 {offsets = [26, 0], sizes = [2, 240], strides = [1, 1]} : vector<28x240xbf16> to vector<2x240xbf16>
    %c13 = arith.constant 13 : index
    %c0_55 = arith.constant 0 : index
    %c0_56 = arith.constant 0 : index
    %99 = vector.load %arg4[%c13, %c0_55, %c0_56] : memref<14x240x24xbf16, #tpu.memory_space<vmem>>, vector<1x240x24xbf16>
    %100 = vector.shape_cast %99 : vector<1x240x24xbf16> to vector<240x24xbf16>
    %cst_57 = arith.constant dense<0.000000e+00> : vector<2x24xf32>
    %101 = tpu.matmul %98, %100, %cst_57 {dimension_numbers = #tpu.dot_dimension_numbers<[1], [0], [0], [1], [0, 0, 1, 1], [], []>} : vector<2x240xbf16>, vector<240x24xbf16>, vector<2x24xf32> -> vector<2x24xf32>
    %102 = arith.addf %97, %101 : vector<2x24xf32>
    %cst_58 = arith.constant 0.000000e+00 : f32
    %103 = vector.broadcast %cst_58 : f32 to vector<2x24xf32>
    %104 = arith.maximumf %102, %103 : vector<2x24xf32>
    %105 = arith.truncf %104 : vector<2x24xf32> to vector<2x24xbf16>
    %c0_59 = arith.constant 0 : index
    %c0_60 = arith.constant 0 : index
    %106 = vector.load %arg5[%c0_59, %c0_60] : memref<24x2xbf16, #tpu.memory_space<vmem>>, vector<24x2xbf16>
    %cst_61 = arith.constant dense<0.000000e+00> : vector<2x2xf32>
    %107 = tpu.matmul %105, %106, %cst_61 {dimension_numbers = #tpu.dot_dimension_numbers<[1], [0], [0], [1], [0, 0, 1, 1], [], []>} : vector<2x24xbf16>, vector<24x2xbf16>, vector<2x2xf32> -> vector<2x2xf32>
    %108 = arith.negf %107 : vector<2x2xf32>
    %109 = math.exp %108 : vector<2x2xf32>
    %cst_62 = arith.constant 1.000000e+00 : f32
    %110 = vector.broadcast %cst_62 : f32 to vector<2x2xf32>
    %111 = arith.addf %110, %109 : vector<2x2xf32>
    %112 = arith.divf %110, %111 : vector<2x2xf32>
    %c0_63 = arith.constant 0 : index
    %c0_64 = arith.constant 0 : index
    %113 = vector.load %arg6[%c0_63, %c0_64] : memref<2x2xf32, #tpu.memory_space<vmem>>, vector<2x2xf32>
    tpu.vector_store %arg6[%c0_63, %c0_64], %112 {strides = array<i32>} : memref<2x2xf32, #tpu.memory_space<vmem>>, vector<2x2xf32>,
    return
  }
}

</mosaic_0001>

<bundles_post_ra>
// kernel: discriminator_forward.1
= control target key start
LH: loop header
LB: loop body
LE: loop exit
PB: predicated region body
PF: predicated region fallthrough
CT: control target
= control target key end

     0   :  { %v3681_v2 = vmov 0   ;;  %vm111_vm0 = vcmask 785408   ;;  %s4738_s0 = inlined_call_operand.vmem [shape: bf16[28,96], index: 0, kind: input, shape index: {}]   ;;  %s4739_s1 = inlined_call_operand.vmem [shape: bf16[96,240], index: 1, kind: input, shape index: {}]   ;;  %s4740_s2 = inlined_call_operand.vmem [shape: f32[1,240], index: 2, kind: input, shape index: {}]   ;;  %s4741_s3 = inlined_call_operand.vmem [shape: f32[1,240], index: 3, kind: input, shape index: {}]   ;;  %s4742_s4 = inlined_call_operand.vmem [shape: bf16[14,240,24], index: 4, kind: input, shape index: {}]   ;;  %s4743_s5 = inlined_call_operand.vmem [shape: bf16[24,2], index: 5, kind: input, shape index: {}]   ;;  %s4744_s6 = inlined_call_operand.hbm [shape: f32[2,2], index: 6, kind: output, shape index: {}]  }
   0x1   :  { %v3419_v0 = vld [vmem:[%s4739_s1 + $0x54] ss:$8 sps:$4 sm:$0xff]   ;;  %v3421_v1 = vld [vmem:[%s4739_s1 + $0x50] ss:$8 sps:$4 sm:$0xff]   ;;  %150 = vmatprep.mubr.bf16.mxu0 %v3681_v2  ;;  %498 = vmatprep.subr.bf16.mxu1 %v3681_v2  ;;  %v3422_v3 = vld [vmem:[%s4739_s1 + $0x44] ss:$8 sps:$4 sm:$0xff]  }
   0x2   :  { %122 = vmatprep.subr.bf16.mxu0 %v3419_v0  ;;  %v3424_v4 = vld [vmem:[%s4739_s1 + $0x40] ss:$8 sps:$4 sm:$0xff]   ;;  %v3425_v5 = vld [vmem:[%s4739_s1 + $0x34] ss:$8 sps:$4 sm:$0xff]   ;;  %v3427_v6 = vld [vmem:[%s4739_s1 + $0x30] ss:$8 sps:$4 sm:$0xff]  }
   0x3   :  { %123 = vmatpush1.bf16.msra.mxu0 %v3421_v1  ;;  %v3428_v7 = vld [vmem:[%s4739_s1 + $0x24] ss:$8 sps:$4 sm:$0xff]   ;;  %v3430_v8 = vld [vmem:[%s4739_s1 + $0x20] ss:$8 sps:$4 sm:$0xff]   ;;  %v3431_v9 = vld [vmem:[%s4739_s1 + $0x14] ss:$8 sps:$4 sm:$0xff]  }
   0x4   :  { %124 = vmatprep.subr.bf16.mxu0 %v3422_v3  ;;  %v3433_v10 = vld [vmem:[%s4739_s1 + $0x10] ss:$8 sps:$4 sm:$0xff]   ;;  %v3434_v11 = vld [vmem:[%s4739_s1 + $0x4] ss:$8 sps:$4 sm:$0xff]   ;;  %v3436_v12 = vld [vmem:[%s4739_s1] ss:$8 sps:$4 sm:$0xff]  }
   0x5   :  { %v3437_v13 = vld [vmem:[%s4738_s0] sm:$0xff]   ;;  %v3438_v14 = vld [vmem:[%s4738_s0 + $0x8] sm:$0x3f]   ;;  %v3439_v15 = vld [vmem:[%s4742_s4 + $0x38] sm:$0xff]  }
   0x6   :  { %v3440_v16 = vld [vmem:[%s4742_s4 + $0xb0] sm:$0xff]   ;;  %v3442_v18 = vld [vmem:[%s4742_s4 + $0xa8] sm:$0xff]   ;;  %v3444_v20 = vld [vmem:[%s4742_s4 + $0xa0] sm:$0xff]  }
   0x7   :  { %125 = vmatpush1.bf16.msra.mxu0 %v3424_v4  ;;  %499 = vmatpush1.bf16.msra.mxu1 %v3440_v16  ;;  %v3441_v17 = vld [vmem:[%s4742_s4 + $0x30] sm:$0xff]   ;;  %v3443_v19 = vld [vmem:[%s4742_s4 + $0x28] sm:$0xff]   ;;  %v3445_v21 = vld [vmem:[%s4742_s4 + $0x20] sm:$0xff]  }
   0x8   :  { %126 = vmatprep.subr.bf16.mxu0 %v3425_v5  ;;  %500 = vmatprep.subr.bf16.mxu1 %v3681_v2  ;;  %v3446_v22 = vld [vmem:[%s4742_s4 + $0x98] sm:$0xff]   ;;  %v3448_v24 = vld [vmem:[%s4742_s4 + $0x90] sm:$0xff]   ;;  %v3450_v26 = vld [vmem:[%s4742_s4 + $0x88] sm:$0xff]  }
   0x9   :  { %v3447_v23 = vld [vmem:[%s4742_s4 + $0x18] sm:$0xff]   ;;  %v3449_v25 = vld [vmem:[%s4742_s4 + $0x10] sm:$0xff]   ;;  %v3451_v27 = vld [vmem:[%s4742_s4 + $0x8] sm:$0xff]  }
   0xa   :  { %v3452_v28 = vld [vmem:[%s4742_s4 + $0x80] sm:$0xff]   ;;  %v3454_v30 = vld [vmem:[%s4742_s4 + $0x78] sm:$0xff]   ;;  %v3455_v31 = vld [vmem:[%s4742_s4 + $0x70] sm:$0xff]  }
   0xb   :  { %127 = vmatpush1.bf16.msra.mxu0 %v3427_v6  ;;  %501 = vmatpush1.bf16.msra.mxu1 %v3442_v18  ;;  %v3453_v29 = vld [vmem:[%s4742_s4] sm:$0xff]   ;;  %v3456_v32 = vld [vmem:[%s4742_s4 + $0xe8] sm:$0xff]   ;;  %v3460_v36 = vld [vmem:[%s4742_s4 + $0xd8] sm:$0xff]  }
   0xc   :  { %128 = vmatprep.subr.bf16.mxu0 %v3428_v7  ;;  %502 = vmatprep.subr.bf16.mxu1 %v3681_v2  ;;  %v3457_v33 = vld [vmem:[%s4742_s4 + $0x68] sm:$0xff]   ;;  %v3458_v34 = vld [vmem:[%s4742_s4 + $0xe0] sm:$0xff]   ;;  %v3461_v37 = vld [vmem:[%s4742_s4 + $0x58] sm:$0xff]  }
   0xd   :  { %v3459_v35 = vld [vmem:[%s4742_s4 + $0x60] sm:$0xff]   ;;  %v3462_v38 = vld [vmem:[%s4742_s4 + $0xd0] sm:$0xff]   ;;  %v3464_v40 = vld [vmem:[%s4742_s4 + $0xc8] sm:$0xff]  }
   0xe   :  { %v3463_v39 = vld [vmem:[%s4742_s4 + $0x50] sm:$0xff]   ;;  %v3465_v41 = vld [vmem:[%s4742_s4 + $0x48] sm:$0xff]   ;;  %v3466_v42 = vld [vmem:[%s4742_s4 + $0xc0] sm:$0xff]  }
   0xf   :  { %129 = vmatpush1.bf16.msra.mxu0 %v3430_v8  ;;  %503 = vmatpush1.bf16.msra.mxu1 %v3444_v20  ;;  %v3467_v43 = vld [vmem:[%s4742_s4 + $0x40] sm:$0xff]   ;;  %v3468_v44 = vld [vmem:[%s4742_s4 + $0xb8] sm:$0xff]  }
  0x10   :  { %130 = vmatprep.subr.bf16.mxu0 %v3431_v9  ;;  %504 = vmatprep.subr.bf16.mxu1 %v3681_v2 }
  0x13   :  { %131 = vmatpush1.bf16.msra.mxu0 %v3433_v10  ;;  %505 = vmatpush1.bf16.msra.mxu1 %v3446_v22 }
  0x14   :  { %132 = vmatprep.subr.bf16.mxu0 %v3434_v11  ;;  %506 = vmatprep.subr.bf16.mxu1 %v3681_v2 }
  0x17   :  { %133 = vmatpush1.bf16.msra.mxu0 %v3436_v12  ;;  %507 = vmatpush1.bf16.msra.mxu1 %v3448_v24 }
  0x18   :  { %631 = vmatprep.subr.bf16.mxu0 %v3681_v2  ;;  %508 = vmatprep.subr.bf16.mxu1 %v3681_v2 }
  0x1a   :  { %2783 = vmatmul.mubr.msk.bf16.vlgmr.msra.gmra.mxu0 %vm111_vm0, %v3437_v13 }
  0x1b   :  { %160 = vmatprep.mubr.bf16.mxu0 %v3681_v2  ;;  %632 = vmatpush1.bf16.msra.mxu0 %v3439_v15 }
  0x1c   :  { %633 = vmatprep.subr.bf16.mxu0 %v3681_v2  ;;  %509 = vmatpush1.bf16.msra.mxu1 %v3450_v26 }
  0x1d   :  { %510 = vmatprep.subr.bf16.mxu1 %v3681_v2 }
  0x1f   :  { %634 = vmatpush1.bf16.msra.mxu0 %v3441_v17 }
  0x20   :  { %635 = vmatprep.subr.bf16.mxu0 %v3681_v2  ;;  %511 = vmatpush1.bf16.msra.mxu1 %v3452_v28 }
  0x21   :  { %512 = vmatprep.subr.bf16.mxu1 %v3681_v2 }
  0x22   :  { %2784 = vmatmul.mubr.msk.bf16.gmra.mxu0 %vm111_vm0, %v3438_v14 }
  0x23   :  { %636 = vmatpush1.bf16.msra.mxu0 %v3443_v19 }
  0x24   :  { %637 = vmatprep.subr.bf16.mxu0 %v3681_v2  ;;  %513 = vmatpush1.bf16.msra.mxu1 %v3454_v30 }
  0x25   :  { %516 = vmatprep.subr.bf16.mxu1 %v3681_v2 }
  0x27   :  { %638 = vmatpush1.bf16.msra.mxu0 %v3445_v21 }
  0x28   :  { %639 = vmatprep.subr.bf16.mxu0 %v3681_v2  ;;  %517 = vmatpush2.bf16.msra.mxu1 %v3456_v32 }
  0x29   :  { %518 = vmatprep.subr.bf16.mxu1 %v3681_v2 }
  0x2b   :  { %640 = vmatpush1.bf16.msra.mxu0 %v3447_v23 }
  0x2c   :  { %641 = vmatprep.subr.bf16.mxu0 %v3681_v2  ;;  %519 = vmatpush2.bf16.msra.mxu1 %v3458_v34 }
  0x2d   :  { %520 = vmatprep.subr.bf16.mxu1 %v3681_v2 }
  0x2f   :  { %642 = vmatpush1.bf16.msra.mxu0 %v3449_v25 }
  0x30   :  { %643 = vmatprep.subr.bf16.mxu0 %v3681_v2  ;;  %521 = vmatpush2.bf16.msra.mxu1 %v3460_v36 }
  0x31   :  { %522 = vmatprep.subr.bf16.mxu1 %v3681_v2 }
  0x33   :  { %644 = vmatpush1.bf16.msra.mxu0 %v3451_v27 }
  0x34   :  { %645 = vmatprep.subr.bf16.mxu0 %v3681_v2  ;;  %523 = vmatpush2.bf16.msra.mxu1 %v3462_v38 }
  0x35   :  { %524 = vmatprep.subr.bf16.mxu1 %v3681_v2 }
  0x37   :  { %646 = vmatpush1.bf16.msra.mxu0 %v3453_v29 }
  0x38   :  { %649 = vmatprep.subr.bf16.mxu0 %v3681_v2  ;;  %525 = vmatpush2.bf16.msra.mxu1 %v3464_v40 }
  0x39   :  { %526 = vmatprep.subr.bf16.mxu1 %v3681_v2 }
  0x3b   :  { %650 = vmatpush2.bf16.msra.mxu0 %v3455_v31 }
  0x3c   :  { %651 = vmatprep.subr.bf16.mxu0 %v3681_v2  ;;  %527 = vmatpush2.bf16.msra.mxu1 %v3466_v42 }
  0x3d   :  { %528 = vmatprep.subr.bf16.mxu1 %v3681_v2 }
  0x3f   :  { %652 = vmatpush2.bf16.msra.mxu0 %v3457_v33 }
  0x40   :  { %653 = vmatprep.subr.bf16.mxu0 %v3681_v2  ;;  %529 = vmatpush2.bf16.msra.mxu1 %v3468_v44 }
  0x43   :  { %654 = vmatpush2.bf16.msra.mxu0 %v3459_v35 }
  0x44   :  { %655 = vmatprep.subr.bf16.mxu0 %v3681_v2 }
  0x47   :  { %656 = vmatpush2.bf16.msra.mxu0 %v3461_v37 }
  0x48   :  { %657 = vmatprep.subr.bf16.mxu0 %v3681_v2 }
  0x4b   :  { %658 = vmatpush2.bf16.msra.mxu0 %v3463_v39 }
  0x4c   :  { %659 = vmatprep.subr.bf16.mxu0 %v3681_v2 }
  0x4f   :  { %660 = vmatpush2.bf16.msra.mxu0 %v3465_v41 }
  0x50   :  { %661 = vmatprep.subr.bf16.mxu0 %v3681_v2 }
  0x53   :  { %662 = vmatpush2.bf16.msra.mxu0 %v3467_v43 }
  0x54   :  { %966 = vmatprep.subr.bf16.mxu0 %v3681_v2 }
  0x55   :  { %11 = vsyncpa [#allocation3], 0  ;;  %798 = vmatprep.subr.bf16.mxu1 %v3681_v2  ;;  %vm206_vm5 = vcmask 916480   ;;  %vm197_vm7 = vcmask 1043456   ;;  %vm212_vm8 = vcmask 912384   ;;  %vm3684_vm12 = vmmov 0  }
  0x56   :  { %vm2700_vm13 = vcmask 195584   ;;  %vm2753_vm14 = vcmask 9216  }
  0xda   :  { %v152_v45 = vpop.f32.mrf.mxu0 }
  0xdb   :  { %v179_v47 = vmul.f32 0.01, %v152_v45  ;;  %vm171_vm2 = vcmp.gt.f32.partialorder %v152_v45, 0.0 }
  0xdc   :  { %v154_v46 = vpop.f32.mrf.mxu0 }
  0xdd   :  { %vm172_vm1 = vcmp.gt.f32.partialorder %v154_v46, 0.0  ;;  %v180_v48 = vmul.f32 0.01, %v154_v46  ;;  %v3889_v53 = vsel %vm171_vm2, %v152_v45, %v179_v47 }
  0xde   :  { %v156_v49 = vpop.f32.mrf.mxu0  ;;  %v223_v60 = vmul.f32 %v3889_v53, %v3889_v53 }
  0xdf   :  { %v3887_v50 = vsel %vm172_vm1, %v154_v46, %v180_v48  ;;  %vm173_vm3 = vcmp.gt.f32.partialorder %v156_v49, 0.0  ;;  %v181_v51 = vmul.f32 0.01, %v156_v49 }
  0xe0   :  { %v158_v52 = vpop.f32.mrf.mxu0  ;;  %v224_v56 = vmul.f32 %v3887_v50, %v3887_v50  ;;  %v207_v4 = vsel %vm206_vm5, %v3887_v50, 0.0 }
  0xe1   :  { %v3891_v54 = vsel %vm173_vm3, %v156_v49, %v181_v51  ;;  %vm174_vm4 = vcmp.gt.f32.partialorder %v158_v52, 0.0  ;;  %v182_v55 = vmul.f32 0.01, %v158_v52 }
  0xe2   :  { %v162_v57 = vpop.f32.mrf.mxu0  ;;  %v225_v61 = vmul.f32 %v3891_v54, %v3891_v54  ;;  %v241_v5 = vsel %vm206_vm5, %v224_v56, 0.0  ;;  %v195_v6 = vadd.f32 %v3891_v54, %v3889_v53 }
  0xe3   :  { %v3895_v58 = vsel %vm174_vm4, %v158_v52, %v182_v55  ;;  %vm175_vm6 = vcmp.gt.f32.partialorder %v162_v57, 0.0  ;;  %v183_v59 = vmul.f32 0.01, %v162_v57 }
  0xe4   :  { %v226_v62 = vmul.f32 %v3895_v58, %v3895_v58  ;;  %v164_v63 = vpop.f32.mrf.mxu0  ;;  %v208_v0 = vsel %vm206_vm5, %v3895_v58, 0.0  ;;  %v231_v12 = vadd.f32 %v225_v61, %v223_v60 }
  0xe5   :  { %v3905_v1 = vsel %vm175_vm6, %v162_v57, %v183_v59  ;;  %vm176_vm9 = vcmp.gt.f32.partialorder %v164_v63, 0.0  ;;  %v184_v3 = vmul.f32 0.01, %v164_v63  ;;  %v209_v13 = vadd.f32 %v208_v0, %v207_v4 }
  0xe6   :  { %v242_v7 = vsel %vm206_vm5, %v226_v62, 0.0  ;;  %v166_v8 = vpop.f32.mrf.mxu0  ;;  %v227_v9 = vmul.f32 %v3905_v1, %v3905_v1  ;;  %v196_v17 = vadd.f32 %v195_v6, %v3905_v1 }
  0xe7   :  { %v3915_v10 = vsel %vm176_vm9, %v164_v63, %v184_v3  ;;  %vm177_vm10 = vcmp.gt.f32.partialorder %v166_v8, 0.0  ;;  %v185_v11 = vmul.f32 0.01, %v166_v8  ;;  %v243_v20 = vadd.f32 %v242_v7, %v241_v5 }
  0xe8   :  { %v210_v14 = vsel %vm206_vm5, %v3915_v10, 0.0  ;;  %v228_v15 = vmul.f32 %v3915_v10, %v3915_v10  ;;  %v168_v16 = vpop.f32.mrf.mxu0  ;;  %v232_v24 = vadd.f32 %v231_v12, %v227_v9 }
  0xe9   :  { %v3922_v18 = vsel %vm177_vm10, %v166_v8, %v185_v11  ;;  %vm178_vm11 = vcmp.gt.f32.partialorder %v168_v16, 0.0  ;;  %v186_v19 = vmul.f32 0.01, %v168_v16  ;;  %v211_v25 = vadd.f32 %v210_v14, %v209_v13 }
  0xea   :  { %v244_v21 = vsel %vm206_vm5, %v228_v15, 0.0  ;;  %v198_v22 = vsel %vm197_vm7, %v3922_v18, 0.0  ;;  %v229_v23 = vmul.f32 %v3922_v18, %v3922_v18  ;;  %v266_v11 = vlaneseq }
  0xeb   :  { %v199_v26 = vadd.f32 %v198_v22, %v196_v17  ;;  %v3929_v27 = vsel %vm178_vm11, %v168_v16, %v186_v19  ;;  %v245_v31 = vadd.f32 %v244_v21, %v243_v20  ;;  %v264_v16 = vld [vmem:[%s4740_s2] sm:$0x3]  ;;  %v3682_v20 = vmov 1966171168  }
  0xec   :  { %v233_v28 = vsel %vm197_vm7, %v229_v23, 0.0  ;;  %v213_v29 = vsel %vm212_vm8, %v3929_v27, 0.0  ;;  %v230_v30 = vmul.f32 %v3929_v27, %v3929_v27  ;;  %v267_v14 = vshrl.u32 %v266_v11, 7  ;;  %v3480_v11 = vld [vmem:[%s4742_s4 + $0x100] sm:$0xff]  }
  0xed   :  { %v200_v32 = vrot.slane %v199_v26, 4  ;;  %v234_v33 = vadd.f32 %v233_v28, %v232_v24  ;;  %v214_v34 = vadd.f32 %v213_v29, %v211_v25  ;;  %v285_v21 = vunpack.c.l.s4 %v3682_v20  ;;  %v3488_v20 = vld [vmem:[%s4742_s4 + $0x158] sm:$0xff]  }
  0xee   :  { %v246_v35 = vsel %vm212_vm8, %v230_v30, 0.0  ;;  %v268_v15 = vsub.s32 0, %v267_v14  ;;  %v272_v17 = vsub.s32 1, %v267_v14 }
  0xef   :  { %v201_v36 = vadd.f32 %v200_v32, %v199_v26  ;;  %v235_v37 = vrot.slane %v234_v33, 4  ;;  %v215_v38 = vrot.slane %v214_v34, 4  ;;  %v247_v39 = vadd.f32 %v246_v35, %v245_v31 }
  0xf0   :  { %v269_v19 = vrot.slane %v264_v16, %v268_v15  ;;  %v273_v22 = vrot.slane %v264_v16, %v272_v17  ;;  %v286_v26 = vunpack.c.0.s8 %v285_v21  ;;  %v3485_v16 = vld [vmem:[%s4742_s4 + $0x1d8] sm:$0xff]   ;;  %v3489_v21 = vld [vmem:[%s4742_s4 + $0x1c8] sm:$0xff]  }
  0xf1   :  { %v202_v40 = vrot.slane %v201_v36, 2  ;;  %v236_v41 = vadd.f32 %v235_v37, %v234_v33  ;;  %v216_v42 = vadd.f32 %v215_v38, %v214_v34  ;;  %v248_v43 = vrot.slane %v247_v39, 4 }
  0xf2   :  { %v289_v34 = vsub.s32 %v286_v26, %v267_v14  ;;  %v3483_v14 = vld [vmem:[%s4742_s4 + $0x168] sm:$0xff]   ;;  %v3494_v26 = vld [vmem:[%s4742_s4 + $0x140] sm:$0xff]  }
  0xf3   :  { %v203_v44 = vadd.f32 %v202_v40, %v201_v36  ;;  %v237_v45 = vrot.slane %v236_v41, 2  ;;  %v217_v46 = vrot.slane %v216_v42, 2  ;;  %v249_v47 = vadd.f32 %v248_v43, %v247_v39  ;;  %v278_v40 = vld [vmem:[%s4741_s3] sm:$0x3] }
  0xf5   :  { %v204_v48 = vrot.slane %v203_v44, 1  ;;  %v238_v49 = vadd.f32 %v237_v45, %v236_v41  ;;  %v218_v51 = vadd.f32 %v217_v46, %v216_v42  ;;  %v250_v52 = vrot.slane %v249_v47, 2 }
  0xf7   :  { %v205_v55 = vadd.f32 %v204_v48, %v203_v44  ;;  %v239_v56 = vrot.slane %v238_v49, 1  ;;  %v219_v57 = vrot.slane %v218_v51, 1  ;;  %v251_v59 = vadd.f32 %v250_v52, %v249_v47 }
  0xf9   :  { %v221_v60 = vmul.f32 0.035714287, %v205_v55  ;;  %v240_v61 = vadd.f32 %v239_v56, %v238_v49  ;;  %v220_v62 = vadd.f32 %v219_v57, %v218_v51  ;;  %v252_v63 = vrot.slane %v251_v59, 1 }
  0xfb   :  { %v254_v0 = vmul.f32 0.035714287, %v240_v61  ;;  %v256_v3 = vmul.f32 %v221_v60, %v221_v60  ;;  %v222_v4 = vmul.f32 0.035714287, %v220_v62  ;;  %v253_v5 = vadd.f32 %v252_v63, %v251_v59  ;;  %v3470_v61 = vld [vmem:[%s4742_s4 + $0x128] sm:$0xff]   ;;  %v3471_v63 = vld [vmem:[%s4742_s4 + $0x198] sm:$0xff]  }
  0xfd   :  { %v258_v6 = vsub.f32 %v254_v0, %v256_v3  ;;  %v255_v7 = vmul.f32 0.035714287, %v253_v5  ;;  %v257_v8 = vmul.f32 %v222_v4, %v222_v4  ;;  %v3472_v0 = vld [vmem:[%s4742_s4 + $0x120] sm:$0xff]   ;;  %v3473_v3 = vld [vmem:[%s4742_s4 + $0x190] sm:$0xff]   ;;  %v3475_v5 = vld [vmem:[%s4742_s4 + $0x188] sm:$0xff]  }
  0xff   :  { %v260_v9 = vadd.f32 1e-05, %v258_v6  ;;  %v259_v12 = vsub.f32 %v255_v7, %v257_v8  ;;  %v3476_v6 = vld [vmem:[%s4742_s4 + $0x110] sm:$0xff]   ;;  %v3477_v7 = vld [vmem:[%s4742_s4 + $0x180] sm:$0xff]   ;;  %v3478_v8 = vld [vmem:[%s4742_s4 + $0x108] sm:$0xff]  }
 0x101   :  { %3651 = vrsqrt.f32 %v260_v9  ;;  %v261_v13 = vadd.f32 1e-05, %v259_v12  ;;  %v3479_v9 = vld [vmem:[%s4742_s4 + $0x178] sm:$0xff]   ;;  %v3481_v12 = vld [vmem:[%s4742_s4 + $0x170] sm:$0xff]  }
 0x103   :  { %3653 = vrsqrt.f32 %v261_v13  ;;  %v3482_v13 = vld [vmem:[%s4742_s4 + $0xf8] sm:$0xff]  }
 0x10e   :  { %v3652_v23 = vpop.eup %3651 }
 0x10f   :  { %v276_v24 = vmul.f32 %v3652_v23, %v269_v19  ;;  %v3487_v19 = vld [vmem:[%s4742_s4 + $0x1d0] sm:$0xff]   ;;  %v3491_v23 = vld [vmem:[%s4742_s4 + $0x1c0] sm:$0xff]  }
 0x110   :  { %v3654_v25 = vpop.eup %3653 }
 0x111   :  { %v303_v28 = vrot.slane %v276_v24, %v268_v15  ;;  %v277_v29 = vmul.f32 %v3654_v25, %v273_v22  ;;  %v279_v32 = vmul.f32 %v276_v24, %v221_v60  ;;  %v3490_v22 = vld [vmem:[%s4742_s4 + $0x150] sm:$0xff]   ;;  %v3492_v24 = vld [vmem:[%s4742_s4 + $0x148] sm:$0xff]   ;;  %v3493_v25 = vld [vmem:[%s4742_s4 + $0x1b8] sm:$0xff]  }
 0x113   :  { %v312_v30 = vmul.f32 %v303_v28, %v3905_v1  ;;  %v314_v31 = vmul.f32 %v303_v28, %v3922_v18  ;;  %v280_v33 = vmul.f32 %v277_v29, %v222_v4  ;;  %v307_v35 = vrot.slane %v277_v29, %v268_v15  ;;  %v3474_v4 = vld [vmem:[%s4742_s4 + $0x118] sm:$0xff]  }
 0x114   :  { %v308_v1 = vmul.f32 %v303_v28, %v3889_v53  ;;  %v310_v18 = vmul.f32 %v303_v28, %v3891_v54  ;;  %v3495_v28 = vld [vmem:[%s4742_s4 + $0x1b0] sm:$0xff]   ;;  %v3496_v29 = vld [vmem:[%s4742_s4 + $0x138] sm:$0xff]  }
 0x115   :  { %v283_v36 = vcombine.low %v279_v32, %v280_v33  ;;  %v313_v37 = vmul.f32 %v307_v35, %v3915_v10  ;;  %v315_v38 = vmul.f32 %v307_v35, %v3929_v27  ;;  %v309_v43 = vmul.f32 %v307_v35, %v3887_v50  ;;  %v3469_v50 = vld [vmem:[%s4742_s4 + $0x1a0] sm:$0xff]   ;;  %v3499_v32 = vld [vmem:[%s4742_s4 + $0x290] sm:$0xff]  }
 0x116   :  { %v311_v44 = vmul.f32 %v307_v35, %v3895_v58  ;;  %v3500_v35 = vld [vmem:[%s4742_s4 + $0x218] sm:$0xff]  }
 0x117   :  { %v290_v39 = vrot.slane %v283_v36, %v289_v34 }
 0x119   :  { %v297_v41 = vrot.slane %v290_v39, %v289_v34  ;;  %v3502_v39 = vld [vmem:[%s4742_s4 + $0x210] sm:$0xff]  }
 0x11b   :  { %v299_v42 = vsub.f32 %v278_v40, %v297_v41  ;;  %v3503_v40 = vld [vmem:[%s4742_s4 + $0x280] sm:$0xff]   ;;  %v3504_v41 = vld [vmem:[%s4742_s4 + $0x208] sm:$0xff]  }
 0x11d   :  { %v320_v45 = vrot.slane %v299_v42, %v268_v15  ;;  %v324_v46 = vrot.slane %v299_v42, %v272_v17  ;;  %v3484_v15 = vld [vmem:[%s4742_s4 + $0xf0] sm:$0xff]   ;;  %v3486_v17 = vld [vmem:[%s4742_s4 + $0x160] sm:$0xff]   ;;  %v3505_v42 = vld [vmem:[%s4742_s4 + $0x278] sm:$0xff]  }
 0x11f   :  { %v327_v10 = vadd.f32 %v320_v45, %v308_v1  ;;  %v328_v47 = vadd.f32 %v324_v46, %v309_v43  ;;  %v329_v27 = vadd.f32 %v320_v45, %v310_v18  ;;  %v330_v48 = vadd.f32 %v324_v46, %v311_v44  ;;  %v3506_v1 = vld [vmem:[%s4742_s4 + $0x200] sm:$0xff]   ;;  %v3507_v18 = vld [vmem:[%s4742_s4 + $0x270] sm:$0xff]   ;;  %v3508_v43 = vld [vmem:[%s4742_s4 + $0x1f8] sm:$0xff]  }
 0x120   :  { %v332_v49 = vadd.f32 %v324_v46, %v313_v37  ;;  %v334_v51 = vadd.f32 %v324_v46, %v315_v38  ;;  %v331_v52 = vadd.f32 %v320_v45, %v312_v30  ;;  %v333_v55 = vadd.f32 %v320_v45, %v314_v31  ;;  %v3497_v30 = vld [vmem:[%s4742_s4 + $0x1a8] sm:$0xff]   ;;  %v3498_v31 = vld [vmem:[%s4742_s4 + $0x130] sm:$0xff]   ;;  %v3511_v46 = vld [vmem:[%s4742_s4 + $0x260] sm:$0xff]  }
 0x121   :  { %v3951_v56 = vpack.c.bf16 %v329_v27, %v327_v10  ;;  %v3953_v57 = vpack.c.bf16 %v330_v48, %v328_v47  ;;  %v3501_v38 = vld [vmem:[%s4742_s4 + $0x288] sm:$0xff]   ;;  %v3510_v45 = vld [vmem:[%s4742_s4 + $0x1f0] sm:$0xff]   ;;  %v3513_v47 = vld [vmem:[%s4742_s4 + $0x258] sm:$0xff]  }
 0x122   :  { %v3958_v53 = vpack.c.bf16 %v334_v51, %v332_v49  ;;  %v3960_v54 = vpack.c.bf16 %v333_v55, %v331_v52  ;;  %v3509_v44 = vld [vmem:[%s4742_s4 + $0x268] sm:$0xff]   ;;  %v3514_v27 = vld [vmem:[%s4742_s4 + $0x1e0] sm:$0xff]   ;;  %v3516_v49 = vld [vmem:[%s4742_s4 + $0x250] sm:$0xff]  }
 0x123   :  { %2846 = vmatprep.mubr.msk.bf16.mxu0 %vm206_vm5, %v3953_v57  ;;  %v403_v58 = vrot.slane %v3953_v57, 1  ;;  %v871_v59 = vrot.slane %v3953_v57, 3  ;;  %v402_v60 = vrot.slane %v3951_v56, 1  ;;  %v703_v62 = vrot.slane %v3953_v57, 2  ;;  %v3512_v10 = vld [vmem:[%s4742_s4 + $0x1e8] sm:$0xff]   ;;  %v3517_v51 = vld [vmem:[%s4742_s4 + $0x2c0] sm:$0xff]  }
 0x124   :  { %664 = vmatmul.mubr.bf16.vlgmr.msra.gmra.mxu0 %v3951_v56  ;;  %v870_v33 = vrot.slane %v3951_v56, 3  ;;  %v1207_v34 = vrot.slane %v3953_v57, 5  ;;  %v702_v36 = vrot.slane %v3951_v56, 2  ;;  %v1039_v37 = vrot.slane %v3953_v57, 4  ;;  %v3515_v48 = vld [vmem:[%s4742_s4 + $0x2c8] sm:$0xff]   ;;  %v3519_v55 = vld [vmem:[%s4742_s4 + $0x2b8] sm:$0xff]  }
 0x125   :  { %967 = vmatpush1.bf16.msra.mxu0 %v3469_v50  ;;  %2830 = vmatprep.mubr.msk.bf16.mxu1 %vm206_vm5, %v403_v58  ;;  %v3518_v52 = vld [vmem:[%s4742_s4 + $0x248] sm:$0xff]   ;;  %v3520_v50 = vld [vmem:[%s4742_s4 + $0x240] sm:$0xff]   ;;  %v3521_v58 = vld [vmem:[%s4742_s4 + $0x2b0] sm:$0xff]  }
 0x126   :  { %2938 = vmatprep.mubr.msk.bf16.mxu0 %vm206_vm5, %v871_v59  ;;  %531 = vmatmul.mubr.bf16.vlgmr.msra.gmra.mxu1 %v402_v60  ;;  %v3522_v59 = vld [vmem:[%s4742_s4 + $0x238] sm:$0xff]   ;;  %v3523_v60 = vld [vmem:[%s4742_s4 + $0x2a8] sm:$0xff]  }
 0x127   :  { %799 = vmatpush1.bf16.msra.mxu1 %v3470_v61  ;;  %2892 = vmatprep.mubr.msk.bf16.mxu1 %vm206_vm5, %v703_v62  ;;  %v3524_v61 = vld [vmem:[%s4742_s4 + $0x230] sm:$0xff]   ;;  %v3525_v62 = vld [vmem:[%s4742_s4 + $0x2a0] sm:$0xff]  }
 0x128   :  { %968 = vmatprep.subr.bf16.mxu0 %v3681_v2  ;;  %800 = vmatprep.subr.bf16.mxu1 %v3681_v2 }
 0x129   :  { %969 = vmatpush1.bf16.msra.mxu0 %v3471_v63  ;;  %v3526_v63 = vld [vmem:[%s4742_s4 + $0x228] sm:$0xff]  }
 0x12a   :  { %970 = vmatprep.subr.bf16.mxu0 %v3681_v2 }
 0x12b   :  { %801 = vmatpush1.bf16.msra.mxu1 %v3472_v0  ;;  %v3527_v0 = vld [vmem:[%s4742_s4 + $0x298] sm:$0xff]  }
 0x12c   :  { %802 = vmatprep.subr.bf16.mxu1 %v3681_v2 }
 0x12d   :  { %971 = vmatpush1.bf16.msra.mxu0 %v3473_v3  ;;  %v3528_v3 = vld [vmem:[%s4742_s4 + $0x220] sm:$0xff]  }
 0x12e   :  { %972 = vmatprep.subr.bf16.mxu0 %v3681_v2 }
 0x12f   :  { %803 = vmatpush1.bf16.msra.mxu1 %v3474_v4  ;;  %v3529_v4 = vld [vmem:[%s4742_s4 + $0x380] sm:$0xff]  }
 0x130   :  { %804 = vmatprep.subr.bf16.mxu1 %v3681_v2 }
 0x131   :  { %973 = vmatpush1.bf16.msra.mxu0 %v3475_v5  ;;  %v1206_v5 = vrot.slane %v3951_v56, 5 }
 0x132   :  { %974 = vmatprep.subr.bf16.mxu0 %v3681_v2 }
 0x133   :  { %805 = vmatpush1.bf16.msra.mxu1 %v3476_v6  ;;  %v1543_v6 = vrot.slane %v3953_v57, 7 }
 0x134   :  { %806 = vmatprep.subr.bf16.mxu1 %v3681_v2 }
 0x135   :  { %975 = vmatpush1.bf16.msra.mxu0 %v3477_v7  ;;  %v3530_v7 = vld [vmem:[%s4742_s4 + $0x308] sm:$0xff]  }
 0x136   :  { %976 = vmatprep.subr.bf16.mxu0 %v3681_v2 }
 0x137   :  { %807 = vmatpush1.bf16.msra.mxu1 %v3478_v8  ;;  %v1038_v8 = vrot.slane %v3951_v56, 4 }
 0x138   :  { %808 = vmatprep.subr.bf16.mxu1 %v3681_v2 }
 0x139   :  { %977 = vmatpush1.bf16.msra.mxu0 %v3479_v9  ;;  %v1375_v9 = vrot.slane %v3953_v57, 6  ;;  %v3533_v57 = vld [vmem:[%s4742_s4 + $0x370] sm:$0xff]  }
 0x13a   :  { %978 = vmatprep.subr.bf16.mxu0 %v3681_v2 }
 0x13b   :  { %809 = vmatpush1.bf16.msra.mxu1 %v3480_v11  ;;  %v3531_v11 = vld [vmem:[%s4742_s4 + $0x378] sm:$0xff]  }
 0x13c   :  { %810 = vmatprep.subr.bf16.mxu1 %v3681_v2 }
 0x13d   :  { %979 = vmatpush1.bf16.msra.mxu0 %v3481_v12  ;;  %v3532_v12 = vld [vmem:[%s4742_s4 + $0x300] sm:$0xff]  }
 0x13e   :  { %980 = vmatprep.subr.bf16.mxu0 %v3681_v2 }
 0x13f   :  { %811 = vmatpush1.bf16.msra.mxu1 %v3482_v13  ;;  %v3534_v13 = vld [vmem:[%s4742_s4 + $0x2f8] sm:$0xff]  }
 0x140   :  { %812 = vmatprep.subr.bf16.mxu1 %v3681_v2 }
 0x141   :  { %981 = vmatpush1.bf16.msra.mxu0 %v3483_v14  ;;  %v3535_v14 = vld [vmem:[%s4742_s4 + $0x368] sm:$0xff]  }
 0x142   :  { %984 = vmatprep.subr.bf16.mxu0 %v3681_v2 }
 0x143   :  { %813 = vmatpush1.bf16.msra.mxu1 %v3484_v15  ;;  %v3536_v15 = vld [vmem:[%s4742_s4 + $0x2f0] sm:$0xff]  }
 0x144   :  { %816 = vmatprep.subr.bf16.mxu1 %v3681_v2 }
 0x145   :  { %985 = vmatpush2.bf16.msra.mxu0 %v3485_v16  ;;  %v3537_v16 = vld [vmem:[%s4742_s4 + $0x360] sm:$0xff]  }
 0x146   :  { %986 = vmatprep.subr.bf16.mxu0 %v3681_v2 }
 0x147   :  { %817 = vmatpush2.bf16.msra.mxu1 %v3486_v17  ;;  %v3538_v17 = vld [vmem:[%s4742_s4 + $0x2e8] sm:$0xff]  }
 0x148   :  { %818 = vmatprep.subr.bf16.mxu1 %v3681_v2 }
 0x149   :  { %987 = vmatpush2.bf16.msra.mxu0 %v3487_v19  ;;  %v3539_v19 = vld [vmem:[%s4742_s4 + $0x358] sm:$0xff]  }
 0x14a   :  { %988 = vmatprep.subr.bf16.mxu0 %v3681_v2 }
 0x14b   :  { %819 = vmatpush2.bf16.msra.mxu1 %v3488_v20  ;;  %v3540_v20 = vld [vmem:[%s4742_s4 + $0x2e0] sm:$0xff]  }
 0x14c   :  { %820 = vmatprep.subr.bf16.mxu1 %v3681_v2 }
 0x14d   :  { %989 = vmatpush2.bf16.msra.mxu0 %v3489_v21  ;;  %v3541_v21 = vld [vmem:[%s4742_s4 + $0x350] sm:$0xff]  }
 0x14e   :  { %990 = vmatprep.subr.bf16.mxu0 %v3681_v2 }
 0x14f   :  { %821 = vmatpush2.bf16.msra.mxu1 %v3490_v22  ;;  %v3542_v22 = vld [vmem:[%s4742_s4 + $0x2d8] sm:$0xff]  }
 0x150   :  { %822 = vmatprep.subr.bf16.mxu1 %v3681_v2 }
 0x151   :  { %991 = vmatpush2.bf16.msra.mxu0 %v3491_v23  ;;  %v3543_v23 = vld [vmem:[%s4742_s4 + $0x348] sm:$0xff]  }
 0x152   :  { %992 = vmatprep.subr.bf16.mxu0 %v3681_v2 }
 0x153   :  { %823 = vmatpush2.bf16.msra.mxu1 %v3492_v24  ;;  %v3544_v24 = vld [vmem:[%s4742_s4 + $0x2d0] sm:$0xff]  }
 0x154   :  { %824 = vmatprep.subr.bf16.mxu1 %v3681_v2 }
 0x155   :  { %993 = vmatpush2.bf16.msra.mxu0 %v3493_v25  ;;  %v3545_v25 = vld [vmem:[%s4742_s4 + $0x3b8] sm:$0xff]  }
 0x156   :  { %994 = vmatprep.subr.bf16.mxu0 %v3681_v2 }
 0x157   :  { %825 = vmatpush2.bf16.msra.mxu1 %v3494_v26  ;;  %v3546_v26 = vld [vmem:[%s4742_s4 + $0x340] sm:$0xff]  }
 0x158   :  { %826 = vmatprep.subr.bf16.mxu1 %v3681_v2 }
 0x159   :  { %995 = vmatpush2.bf16.msra.mxu0 %v3495_v28  ;;  %v3547_v28 = vld [vmem:[%s4742_s4 + $0x3b0] sm:$0xff]  }
 0x15a   :  { %996 = vmatprep.subr.bf16.mxu0 %v3681_v2 }
 0x15b   :  { %827 = vmatpush2.bf16.msra.mxu1 %v3496_v29  ;;  %v3548_v29 = vld [vmem:[%s4742_s4 + $0x338] sm:$0xff]  }
 0x15c   :  { %828 = vmatprep.subr.bf16.mxu1 %v3681_v2 }
 0x15d   :  { %997 = vmatpush2.bf16.msra.mxu0 %v3497_v30  ;;  %v3549_v30 = vld [vmem:[%s4742_s4 + $0x3a8] sm:$0xff]  }
 0x15e   :  { %1302 = vmatprep.subr.bf16.mxu0 %v3681_v2 }
 0x15f   :  { %829 = vmatpush2.bf16.msra.mxu1 %v3498_v31  ;;  %v3550_v31 = vld [vmem:[%s4742_s4 + $0x330] sm:$0xff]  }
 0x160   :  { %999 = vmatmul.mubr.bf16.vlgmr.msra.gmra.mxu0 %v870_v33  ;;  %1134 = vmatprep.subr.bf16.mxu1 %v3681_v2  ;;  %v3552_v33 = vld [vmem:[%s4742_s4 + $0x328] sm:$0xff]  }
 0x161   :  { %1303 = vmatpush1.bf16.msra.mxu0 %v3499_v32  ;;  %3030 = vmatprep.mubr.msk.bf16.mxu0 %vm206_vm5, %v1207_v34  ;;  %v3551_v32 = vld [vmem:[%s4742_s4 + $0x3a0] sm:$0xff]   ;;  %v3553_v34 = vld [vmem:[%s4742_s4 + $0x398] sm:$0xff]  }
 0x162   :  { %831 = vmatmul.mubr.bf16.vlgmr.msra.gmra.mxu1 %v702_v36  ;;  %1304 = vmatprep.subr.bf16.mxu0 %v3681_v2  ;;  %v3555_v36 = vld [vmem:[%s4742_s4 + $0x390] sm:$0xff]  }
 0x163   :  { %1135 = vmatpush1.bf16.msra.mxu1 %v3500_v35  ;;  %2984 = vmatprep.mubr.msk.bf16.mxu1 %vm206_vm5, %v1039_v37  ;;  %v3554_v35 = vld [vmem:[%s4742_s4 + $0x320] sm:$0xff]   ;;  %v3556_v37 = vld [vmem:[%s4742_s4 + $0x318] sm:$0xff]  }
 0x164   :  { %1136 = vmatprep.subr.bf16.mxu1 %v3681_v2 }
 0x165   :  { %1305 = vmatpush1.bf16.msra.mxu0 %v3501_v38  ;;  %v3557_v38 = vld [vmem:[%s4742_s4 + $0x388] sm:$0xff]  }
 0x166   :  { %1306 = vmatprep.subr.bf16.mxu0 %v3681_v2 }
 0x167   :  { %1137 = vmatpush1.bf16.msra.mxu1 %v3502_v39  ;;  %v3558_v39 = vld [vmem:[%s4742_s4 + $0x310] sm:$0xff]  }
 0x168   :  { %1138 = vmatprep.subr.bf16.mxu1 %v3681_v2 }
 0x169   :  { %1307 = vmatpush1.bf16.msra.mxu0 %v3503_v40  ;;  %v3559_v40 = vld [vmem:[%s4742_s4 + $0x470] sm:$0xff]  }
 0x16a   :  { %1308 = vmatprep.subr.bf16.mxu0 %v3681_v2 }
 0x16b   :  { %1139 = vmatpush1.bf16.msra.mxu1 %v3504_v41  ;;  %v1542_v41 = vrot.slane %v3951_v56, 7 }
 0x16c   :  { %1140 = vmatprep.subr.bf16.mxu1 %v3681_v2 }
 0x16d   :  { %1309 = vmatpush1.bf16.msra.mxu0 %v3505_v42  ;;  %v1878_v42 = vrot.slane %v3958_v53, 1 }
 0x16e   :  { %1310 = vmatprep.subr.bf16.mxu0 %v3681_v2 }
 0x16f   :  { %1141 = vmatpush1.bf16.msra.mxu1 %v3506_v1  ;;  %v3560_v1 = vld [vmem:[%s4742_s4 + $0x3f8] sm:$0xff]  }
 0x170   :  { %1142 = vmatprep.subr.bf16.mxu1 %v3681_v2 }
 0x171   :  { %1311 = vmatpush1.bf16.msra.mxu0 %v3507_v18  ;;  %v1374_v18 = vrot.slane %v3951_v56, 6  ;;  %v3562_v56 = vld [vmem:[%s4742_s4 + $0x3f0] sm:$0xff]  }
 0x172   :  { %1312 = vmatprep.subr.bf16.mxu0 %v3681_v2 }
 0x173   :  { %1143 = vmatpush1.bf16.msra.mxu1 %v3508_v43  ;;  %v3561_v43 = vld [vmem:[%s4742_s4 + $0x468] sm:$0xff]  }
 0x174   :  { %1144 = vmatprep.subr.bf16.mxu1 %v3681_v2 }
 0x175   :  { %1313 = vmatpush1.bf16.msra.mxu0 %v3509_v44  ;;  %v3563_v44 = vld [vmem:[%s4742_s4 + $0x460] sm:$0xff]  }
 0x176   :  { %1314 = vmatprep.subr.bf16.mxu0 %v3681_v2 }
 0x177   :  { %1145 = vmatpush1.bf16.msra.mxu1 %v3510_v45  ;;  %v3564_v45 = vld [vmem:[%s4742_s4 + $0x3e8] sm:$0xff]  }
 0x178   :  { %1146 = vmatprep.subr.bf16.mxu1 %v3681_v2 }
 0x179   :  { %1315 = vmatpush1.bf16.msra.mxu0 %v3511_v46  ;;  %v3565_v46 = vld [vmem:[%s4742_s4 + $0x458] sm:$0xff]  }
 0x17a   :  { %1316 = vmatprep.subr.bf16.mxu0 %v3681_v2 }
 0x17b   :  { %1147 = vmatpush1.bf16.msra.mxu1 %v3512_v10  ;;  %v3566_v10 = vld [vmem:[%s4742_s4 + $0x3e0] sm:$0xff]  }
 0x17c   :  { %1148 = vmatprep.subr.bf16.mxu1 %v3681_v2 }
 0x17d   :  { %1317 = vmatpush1.bf16.msra.mxu0 %v3513_v47 }
 0x17e   :  { %1320 = vmatprep.subr.bf16.mxu0 %v3681_v2 }
 0x17f   :  { %1149 = vmatpush1.bf16.msra.mxu1 %v3514_v27  ;;  %v3567_v27 = vld [vmem:[%s4742_s4 + $0x450] sm:$0xff]  }
 0x180   :  { %1152 = vmatprep.subr.bf16.mxu1 %v3681_v2 }
 0x181   :  { %1321 = vmatpush2.bf16.msra.mxu0 %v3515_v48 }
 0x182   :  { %1322 = vmatprep.subr.bf16.mxu0 %v3681_v2 }
 0x183   :  { %1153 = vmatpush2.bf16.msra.mxu1 %v3516_v49 }
 0x184   :  { %1154 = vmatprep.subr.bf16.mxu1 %v3681_v2 }
 0x185   :  { %1323 = vmatpush2.bf16.msra.mxu0 %v3517_v51 }
 0x186   :  { %1324 = vmatprep.subr.bf16.mxu0 %v3681_v2 }
 0x187   :  { %1155 = vmatpush2.bf16.msra.mxu1 %v3518_v52  ;;  %v3568_v52 = vld [vmem:[%s4742_s4 + $0x3d8] sm:$0xff]  }
 0x188   :  { %1156 = vmatprep.subr.bf16.mxu1 %v3681_v2 }
 0x189   :  { %1325 = vmatpush2.bf16.msra.mxu0 %v3519_v55 }
 0x18a   :  { %1326 = vmatprep.subr.bf16.mxu0 %v3681_v2 }
 0x18b   :  { %1157 = vmatpush2.bf16.msra.mxu1 %v3520_v50 }
 0x18c   :  { %1158 = vmatprep.subr.bf16.mxu1 %v3681_v2 }
 0x18d   :  { %1327 = vmatpush2.bf16.msra.mxu0 %v3521_v58  ;;  %v3569_v58 = vld [vmem:[%s4742_s4 + $0x448] sm:$0xff]  }
 0x18e   :  { %1328 = vmatprep.subr.bf16.mxu0 %v3681_v2 }
 0x18f   :  { %1159 = vmatpush2.bf16.msra.mxu1 %v3522_v59 }
 0x190   :  { %1160 = vmatprep.subr.bf16.mxu1 %v3681_v2 }
 0x191   :  { %1329 = vmatpush2.bf16.msra.mxu0 %v3523_v60 }
 0x192   :  { %1330 = vmatprep.subr.bf16.mxu0 %v3681_v2 }
 0x193   :  { %1161 = vmatpush2.bf16.msra.mxu1 %v3524_v61  ;;  %v3570_v61 = vld [vmem:[%s4742_s4 + $0x3d0] sm:$0xff]  }
 0x194   :  { %1162 = vmatprep.subr.bf16.mxu1 %v3681_v2 }
 0x195   :  { %1331 = vmatpush2.bf16.msra.mxu0 %v3525_v62 }
 0x196   :  { %1332 = vmatprep.subr.bf16.mxu0 %v3681_v2 }
 0x197   :  { %1163 = vmatpush2.bf16.msra.mxu1 %v3526_v63  ;;  %v3571_v63 = vld [vmem:[%s4742_s4 + $0x440] sm:$0xff]  }
 0x198   :  { %1164 = vmatprep.subr.bf16.mxu1 %v3681_v2 }
 0x199   :  { %1333 = vmatpush2.bf16.msra.mxu0 %v3527_v0  ;;  %v3572_v0 = vld [vmem:[%s4742_s4 + $0x3c8] sm:$0xff]  }
 0x19a   :  { %1638 = vmatprep.subr.bf16.mxu0 %v3681_v2 }
 0x19b   :  { %1165 = vmatpush2.bf16.msra.mxu1 %v3528_v3  ;;  %v3573_v3 = vld [vmem:[%s4742_s4 + $0x438] sm:$0xff]  }
 0x19c   :  { %1335 = vmatmul.mubr.bf16.vlgmr.msra.gmra.mxu0 %v1206_v5  ;;  %1470 = vmatprep.subr.bf16.mxu1 %v3681_v2  ;;  %v3575_v5 = vld [vmem:[%s4742_s4 + $0x4a8] sm:$0xff]  }
 0x19d   :  { %1639 = vmatpush1.bf16.msra.mxu0 %v3529_v4  ;;  %3122 = vmatprep.mubr.msk.bf16.mxu0 %vm206_vm5, %v1543_v6  ;;  %v3574_v4 = vld [vmem:[%s4742_s4 + $0x3c0] sm:$0xff]   ;;  %v3576_v6 = vld [vmem:[%s4742_s4 + $0x430] sm:$0xff]  }
 0x19e   :  { %1167 = vmatmul.mubr.bf16.vlgmr.msra.gmra.mxu1 %v1038_v8  ;;  %1640 = vmatprep.subr.bf16.mxu0 %v3681_v2  ;;  %v3578_v8 = vld [vmem:[%s4742_s4 + $0x428] sm:$0xff]  }
 0x19f   :  { %1471 = vmatpush1.bf16.msra.mxu1 %v3530_v7  ;;  %3076 = vmatprep.mubr.msk.bf16.mxu1 %vm206_vm5, %v1375_v9  ;;  %v3577_v7 = vld [vmem:[%s4742_s4 + $0x4a0] sm:$0xff]   ;;  %v3579_v9 = vld [vmem:[%s4742_s4 + $0x498] sm:$0xff]  }
 0x1a0   :  { %1472 = vmatprep.subr.bf16.mxu1 %v3681_v2 }
 0x1a1   :  { %1641 = vmatpush1.bf16.msra.mxu0 %v3531_v11  ;;  %v3580_v11 = vld [vmem:[%s4742_s4 + $0x420] sm:$0xff]  }
 0x1a2   :  { %1642 = vmatprep.subr.bf16.mxu0 %v3681_v2 }
 0x1a3   :  { %1473 = vmatpush1.bf16.msra.mxu1 %v3532_v12  ;;  %v3581_v12 = vld [vmem:[%s4742_s4 + $0x490] sm:$0xff]  }
 0x1a4   :  { %1474 = vmatprep.subr.bf16.mxu1 %v3681_v2 }
 0x1a5   :  { %1643 = vmatpush1.bf16.msra.mxu0 %v3533_v57  ;;  %v3582_v57 = vld [vmem:[%s4742_s4 + $0x418] sm:$0xff]  }
 0x1a6   :  { %1644 = vmatprep.subr.bf16.mxu0 %v3681_v2 }
 0x1a7   :  { %1475 = vmatpush1.bf16.msra.mxu1 %v3534_v13  ;;  %v3583_v13 = vld [vmem:[%s4742_s4 + $0x488] sm:$0xff]  }
 0x1a8   :  { %1476 = vmatprep.subr.bf16.mxu1 %v3681_v2 }
 0x1a9   :  { %1645 = vmatpush1.bf16.msra.mxu0 %v3535_v14  ;;  %v3584_v14 = vld [vmem:[%s4742_s4 + $0x410] sm:$0xff]  }
 0x1aa   :  { %1646 = vmatprep.subr.bf16.mxu0 %v3681_v2 }
 0x1ab   :  { %1477 = vmatpush1.bf16.msra.mxu1 %v3536_v15  ;;  %v3585_v15 = vld [vmem:[%s4742_s4 + $0x480] sm:$0xff]  }
 0x1ac   :  { %1478 = vmatprep.subr.bf16.mxu1 %v3681_v2 }
 0x1ad   :  { %1647 = vmatpush1.bf16.msra.mxu0 %v3537_v16  ;;  %v3586_v16 = vld [vmem:[%s4742_s4 + $0x408] sm:$0xff]  }
 0x1ae   :  { %1648 = vmatprep.subr.bf16.mxu0 %v3681_v2 }
 0x1af   :  { %1479 = vmatpush1.bf16.msra.mxu1 %v3538_v17  ;;  %v3587_v17 = vld [vmem:[%s4742_s4 + $0x478] sm:$0xff]  }
 0x1b0   :  { %1480 = vmatprep.subr.bf16.mxu1 %v3681_v2 }
 0x1b1   :  { %1649 = vmatpush1.bf16.msra.mxu0 %v3539_v19  ;;  %v3588_v19 = vld [vmem:[%s4742_s4 + $0x400] sm:$0xff]  }
 0x1b2   :  { %1650 = vmatprep.subr.bf16.mxu0 %v3681_v2 }
 0x1b3   :  { %1481 = vmatpush1.bf16.msra.mxu1 %v3540_v20  ;;  %v3589_v20 = vld [vmem:[%s4742_s4 + $0x560] sm:$0xff]  }
 0x1b4   :  { %1482 = vmatprep.subr.bf16.mxu1 %v3681_v2 }
 0x1b5   :  { %1651 = vmatpush1.bf16.msra.mxu0 %v3541_v21  ;;  %v1877_v21 = vrot.slane %v3960_v54, 1 }
 0x1b6   :  { %1652 = vmatprep.subr.bf16.mxu0 %v3681_v2 }
 0x1b7   :  { %1483 = vmatpush1.bf16.msra.mxu1 %v3542_v22  ;;  %v2214_v22 = vrot.slane %v3958_v53, 3 }
 0x1b8   :  { %1484 = vmatprep.subr.bf16.mxu1 %v3681_v2 }
 0x1b9   :  { %1653 = vmatpush1.bf16.msra.mxu0 %v3543_v23  ;;  %v3590_v23 = vld [vmem:[%s4742_s4 + $0x4e8] sm:$0xff]  }
 0x1ba   :  { %1656 = vmatprep.subr.bf16.mxu0 %v3681_v2 }
 0x1bb   :  { %1485 = vmatpush1.bf16.msra.mxu1 %v3544_v24  ;;  %v2046_v24 = vrot.slane %v3958_v53, 2 }
 0x1bc   :  { %1488 = vmatprep.subr.bf16.mxu1 %v3681_v2 }
 0x1bd   :  { %1657 = vmatpush2.bf16.msra.mxu0 %v3545_v25  ;;  %v3591_v25 = vld [vmem:[%s4742_s4 + $0x558] sm:$0xff]  }
 0x1be   :  { %1658 = vmatprep.subr.bf16.mxu0 %v3681_v2 }
 0x1bf   :  { %1489 = vmatpush2.bf16.msra.mxu1 %v3546_v26  ;;  %v3592_v26 = vld [vmem:[%s4742_s4 + $0x4e0] sm:$0xff]  }
 0x1c0   :  { %1490 = vmatprep.subr.bf16.mxu1 %v3681_v2 }
 0x1c1   :  { %1659 = vmatpush2.bf16.msra.mxu0 %v3547_v28  ;;  %v3593_v28 = vld [vmem:[%s4742_s4 + $0x550] sm:$0xff]  }
 0x1c2   :  { %1660 = vmatprep.subr.bf16.mxu0 %v3681_v2 }
 0x1c3   :  { %1491 = vmatpush2.bf16.msra.mxu1 %v3548_v29  ;;  %v3594_v29 = vld [vmem:[%s4742_s4 + $0x4d8] sm:$0xff]  }
 0x1c4   :  { %1492 = vmatprep.subr.bf16.mxu1 %v3681_v2 }
 0x1c5   :  { %1661 = vmatpush2.bf16.msra.mxu0 %v3549_v30  ;;  %v3595_v30 = vld [vmem:[%s4742_s4 + $0x548] sm:$0xff]  }
 0x1c6   :  { %1662 = vmatprep.subr.bf16.mxu0 %v3681_v2 }
 0x1c7   :  { %1493 = vmatpush2.bf16.msra.mxu1 %v3550_v31  ;;  %v3596_v31 = vld [vmem:[%s4742_s4 + $0x4d0] sm:$0xff]  }
 0x1c8   :  { %1494 = vmatprep.subr.bf16.mxu1 %v3681_v2 }
 0x1c9   :  { %1663 = vmatpush2.bf16.msra.mxu0 %v3551_v32 }
 0x1ca   :  { %1664 = vmatprep.subr.bf16.mxu0 %v3681_v2 }
 0x1cb   :  { %1495 = vmatpush2.bf16.msra.mxu1 %v3552_v33  ;;  %v3597_v33 = vld [vmem:[%s4742_s4 + $0x540] sm:$0xff]  }
 0x1cc   :  { %1496 = vmatprep.subr.bf16.mxu1 %v3681_v2 }
 0x1cd   :  { %1665 = vmatpush2.bf16.msra.mxu0 %v3553_v34 }
 0x1ce   :  { %1666 = vmatprep.subr.bf16.mxu0 %v3681_v2 }
 0x1cf   :  { %1497 = vmatpush2.bf16.msra.mxu1 %v3554_v35 }
 0x1d0   :  { %1498 = vmatprep.subr.bf16.mxu1 %v3681_v2 }
 0x1d1   :  { %1667 = vmatpush2.bf16.msra.mxu0 %v3555_v36 }
 0x1d2   :  { %1668 = vmatprep.subr.bf16.mxu0 %v3681_v2 }
 0x1d3   :  { %1499 = vmatpush2.bf16.msra.mxu1 %v3556_v37  ;;  %v3598_v37 = vld [vmem:[%s4742_s4 + $0x4c8] sm:$0xff]  }
 0x1d4   :  { %1500 = vmatprep.subr.bf16.mxu1 %v3681_v2 }
 0x1d5   :  { %1669 = vmatpush2.bf16.msra.mxu0 %v3557_v38 }
 0x1d6   :  { %1973 = vmatprep.subr.bf16.mxu0 %v3681_v2 }
 0x1d7   :  { %1501 = vmatpush2.bf16.msra.mxu1 %v3558_v39 }
 0x1d8   :  { %1671 = vmatmul.mubr.bf16.vlgmr.msra.gmra.mxu0 %v1542_v41  ;;  %1803 = vmatprep.subr.bf16.mxu1 %v3681_v2 }
 0x1d9   :  { %1974 = vmatpush1.bf16.msra.mxu0 %v3559_v40  ;;  %3214 = vmatprep.mubr.msk.bf16.mxu0 %vm206_vm5, %v1878_v42  ;;  %v3599_v40 = vld [vmem:[%s4742_s4 + $0x538] sm:$0xff]  }
 0x1da   :  { %1503 = vmatmul.mubr.bf16.vlgmr.msra.gmra.mxu1 %v1374_v18  ;;  %1975 = vmatprep.subr.bf16.mxu0 %v3681_v2  ;;  %v3600_v18 = vld [vmem:[%s4742_s4 + $0x4c0] sm:$0xff]  }
 0x1db   :  { %1804 = vmatpush1.bf16.msra.mxu1 %v3560_v1  ;;  %3168 = vmatprep.mubr.msk.bf16.mxu1 %vm206_vm5, %v3958_v53 }
 0x1dc   :  { %1805 = vmatprep.subr.bf16.mxu1 %v3681_v2 }
 0x1dd   :  { %1976 = vmatpush1.bf16.msra.mxu0 %v3561_v43 }
 0x1de   :  { %1977 = vmatprep.subr.bf16.mxu0 %v3681_v2 }
 0x1df   :  { %1806 = vmatpush1.bf16.msra.mxu1 %v3562_v56  ;;  %v3601_v56 = vld [vmem:[%s4742_s4 + $0x530] sm:$0xff]  }
 0x1e0   :  { %1807 = vmatprep.subr.bf16.mxu1 %v3681_v2 }
 0x1e1   :  { %1978 = vmatpush1.bf16.msra.mxu0 %v3563_v44  ;;  %v3602_v44 = vld [vmem:[%s4742_s4 + $0x4b8] sm:$0xff]  }
 0x1e2   :  { %1979 = vmatprep.subr.bf16.mxu0 %v3681_v2 }
 0x1e3   :  { %1808 = vmatpush1.bf16.msra.mxu1 %v3564_v45  ;;  %v3603_v45 = vld [vmem:[%s4742_s4 + $0x528] sm:$0xff]  }
 0x1e4   :  { %v665_v47 = vpop.f32.mrf.mxu0  ;;  %1809 = vmatprep.subr.bf16.mxu1 %v3681_v2 }
 0x1e5   :  { %1980 = vmatpush1.bf16.msra.mxu0 %v3565_v46  ;;  %v3604_v46 = vld [vmem:[%s4742_s4 + $0x4b0] sm:$0xff]  }
 0x1e6   :  { %v532_v48 = vpop.f32.mrf.mxu1  ;;  %v667_v49 = vpop.f32.mrf.mxu0  ;;  %1981 = vmatprep.subr.bf16.mxu0 %v3681_v2 }
 0x1e7   :  { %v4381_v51 = vadd.f32 %v665_v47, %v532_v48  ;;  %1810 = vmatpush1.bf16.msra.mxu1 %v3566_v10  ;;  %v3605_v10 = vld [vmem:[%s4742_s4 + $0x598] sm:$0xff]   ;;  %v3606_v47 = vld [vmem:[%s4742_s4 + $0x520] sm:$0xff]   ;;  %v3609_v49 = vld [vmem:[%s4742_s4 + $0x588] sm:$0xff]  }
 0x1e8   :  { %v534_v55 = vpop.f32.mrf.mxu1  ;;  %v668_v50 = vpop.f32.mrf.mxu0  ;;  %1811 = vmatprep.subr.bf16.mxu1 %v3681_v2  ;;  %v3608_v48 = vld [vmem:[%s4742_s4 + $0x518] sm:$0xff]  }
 0x1e9   :  { %1982 = vmatpush1.bf16.msra.mxu0 %v3567_v27  ;;  %v3607_v27 = vld [vmem:[%s4742_s4 + $0x590] sm:$0xff]   ;;  %v3612_v55 = vld [vmem:[%s4742_s4 + $0x508] sm:$0xff]   ;;  %v3613_v50 = vld [vmem:[%s4742_s4 + $0x578] sm:$0xff]  }
 0x1ea   :  { %v535_v59 = vpop.f32.mrf.mxu1  ;;  %v669_v60 = vpop.f32.mrf.mxu0  ;;  %1983 = vmatprep.subr.bf16.mxu0 %v3681_v2 }
 0x1eb   :  { %1812 = vmatpush1.bf16.msra.mxu1 %v3568_v52  ;;  %v3611_v52 = vld [vmem:[%s4742_s4 + $0x580] sm:$0xff]   ;;  %v3615_v59 = vld [vmem:[%s4742_s4 + $0x570] sm:$0xff]   ;;  %v3616_v60 = vld [vmem:[%s4742_s4 + $0x4f8] sm:$0xff]  }
 0x1ec   :  { %v536_v62 = vpop.f32.mrf.mxu1  ;;  %1813 = vmatprep.subr.bf16.mxu1 %v3681_v2 }
 0x1ed   :  { %1984 = vmatpush1.bf16.msra.mxu0 %v3569_v58  ;;  %v3614_v58 = vld [vmem:[%s4742_s4 + $0x500] sm:$0xff]   ;;  %v3618_v62 = vld [vmem:[%s4742_s4 + $0x4f0] sm:$0xff]  }
 0x1ee   :  { %1985 = vmatprep.subr.bf16.mxu0 %v3681_v2 }
 0x1ef   :  { %1814 = vmatpush1.bf16.msra.mxu1 %v3570_v61  ;;  %v3617_v61 = vld [vmem:[%s4742_s4 + $0x568] sm:$0xff]  }
 0x1f0   :  { %1815 = vmatprep.subr.bf16.mxu1 %v3681_v2 }
 0x1f1   :  { %1986 = vmatpush1.bf16.msra.mxu0 %v3571_v63  ;;  %v3619_v63 = vld [vmem:[%s4742_s4 + $0x650] sm:$0xff]  }
 0x1f2   :  { %1987 = vmatprep.subr.bf16.mxu0 %v3681_v2 }
 0x1f3   :  { %1816 = vmatpush1.bf16.msra.mxu1 %v3572_v0  ;;  %v2213_v0 = vrot.slane %v3960_v54, 3 }
 0x1f4   :  { %1817 = vmatprep.subr.bf16.mxu1 %v3681_v2 }
 0x1f5   :  { %1988 = vmatpush1.bf16.msra.mxu0 %v3573_v3  ;;  %v2550_v3 = vrot.slane %v3958_v53, 5 }
 0x1f6   :  { %1991 = vmatprep.subr.bf16.mxu0 %v3681_v2 }
 0x1f7   :  { %1818 = vmatpush1.bf16.msra.mxu1 %v3574_v4  ;;  %v3620_v4 = vld [vmem:[%s4742_s4 + $0x5d8] sm:$0xff]  }
 0x1f8   :  { %1821 = vmatprep.subr.bf16.mxu1 %v3681_v2 }
 0x1f9   :  { %1992 = vmatpush2.bf16.msra.mxu0 %v3575_v5  ;;  %v2045_v5 = vrot.slane %v3960_v54, 2 }
 0x1fa   :  { %1993 = vmatprep.subr.bf16.mxu0 %v3681_v2 }
 0x1fb   :  { %1822 = vmatpush2.bf16.msra.mxu1 %v3576_v6  ;;  %v2382_v6 = vrot.slane %v3958_v53, 4  ;;  %v3623_v53 = vld [vmem:[%s4742_s4 + $0x640] sm:$0xff]  }
 0x1fc   :  { %1823 = vmatprep.subr.bf16.mxu1 %v3681_v2 }
 0x1fd   :  { %1994 = vmatpush2.bf16.msra.mxu0 %v3577_v7  ;;  %v3621_v7 = vld [vmem:[%s4742_s4 + $0x648] sm:$0xff]  }
 0x1fe   :  { %1995 = vmatprep.subr.bf16.mxu0 %v3681_v2 }
 0x1ff   :  { %1824 = vmatpush2.bf16.msra.mxu1 %v3578_v8  ;;  %v3622_v8 = vld [vmem:[%s4742_s4 + $0x5d0] sm:$0xff]  }
 0x200   :  { %1825 = vmatprep.subr.bf16.mxu1 %v3681_v2 }
 0x201   :  { %1996 = vmatpush2.bf16.msra.mxu0 %v3579_v9  ;;  %v3624_v9 = vld [vmem:[%s4742_s4 + $0x5c8] sm:$0xff]  }
 0x202   :  { %1997 = vmatprep.subr.bf16.mxu0 %v3681_v2 }
 0x203   :  { %1826 = vmatpush2.bf16.msra.mxu1 %v3580_v11  ;;  %v3625_v11 = vld [vmem:[%s4742_s4 + $0x638] sm:$0xff]  }
 0x204   :  { %1827 = vmatprep.subr.bf16.mxu1 %v3681_v2 }
 0x205   :  { %1998 = vmatpush2.bf16.msra.mxu0 %v3581_v12  ;;  %v3626_v12 = vld [vmem:[%s4742_s4 + $0x5c0] sm:$0xff]  }
 0x206   :  { %1999 = vmatprep.subr.bf16.mxu0 %v3681_v2 }
 0x207   :  { %1828 = vmatpush2.bf16.msra.mxu1 %v3582_v57 }
 0x208   :  { %1829 = vmatprep.subr.bf16.mxu1 %v3681_v2 }
 0x209   :  { %2000 = vmatpush2.bf16.msra.mxu0 %v3583_v13  ;;  %v3627_v13 = vld [vmem:[%s4742_s4 + $0x630] sm:$0xff]  }
 0x20a   :  { %2001 = vmatprep.subr.bf16.mxu0 %v3681_v2 }
 0x20b   :  { %1830 = vmatpush2.bf16.msra.mxu1 %v3584_v14 }
 0x20c   :  { %1831 = vmatprep.subr.bf16.mxu1 %v3681_v2 }
 0x20d   :  { %2002 = vmatpush2.bf16.msra.mxu0 %v3585_v15 }
 0x20e   :  { %2003 = vmatprep.subr.bf16.mxu0 %v3681_v2 }
 0x20f   :  { %1832 = vmatpush2.bf16.msra.mxu1 %v3586_v16 }
 0x210   :  { %1833 = vmatprep.subr.bf16.mxu1 %v3681_v2 }
 0x211   :  { %2004 = vmatpush2.bf16.msra.mxu0 %v3587_v17  ;;  %v3628_v17 = vld [vmem:[%s4742_s4 + $0x5b8] sm:$0xff]  }
 0x212   :  { %2309 = vmatprep.subr.bf16.mxu0 %v3681_v2 }
 0x213   :  { %1834 = vmatpush2.bf16.msra.mxu1 %v3588_v19 }
 0x214   :  { %2006 = vmatmul.mubr.bf16.vlgmr.msra.gmra.mxu0 %v1877_v21  ;;  %2141 = vmatprep.subr.bf16.mxu1 %v3681_v2  ;;  %v3629_v21 = vld [vmem:[%s4742_s4 + $0x628] sm:$0xff]  }
 0x215   :  { %2310 = vmatpush1.bf16.msra.mxu0 %v3589_v20  ;;  %3306 = vmatprep.mubr.msk.bf16.mxu0 %vm206_vm5, %v2214_v22 }
 0x216   :  { %1836 = vmatmul.mubr.bf16.vlgmr.msra.gmra.mxu1 %v3960_v54  ;;  %2311 = vmatprep.subr.bf16.mxu0 %v3681_v2 }
 0x217   :  { %2142 = vmatpush1.bf16.msra.mxu1 %v3590_v23  ;;  %3260 = vmatprep.mubr.msk.bf16.mxu1 %vm206_vm5, %v2046_v24 }
 0x218   :  { %2143 = vmatprep.subr.bf16.mxu1 %v3681_v2 }
 0x219   :  { %2312 = vmatpush1.bf16.msra.mxu0 %v3591_v25  ;;  %v3630_v25 = vld [vmem:[%s4742_s4 + $0x5b0] sm:$0xff]  }
 0x21a   :  { %2313 = vmatprep.subr.bf16.mxu0 %v3681_v2 }
 0x21b   :  { %2144 = vmatpush1.bf16.msra.mxu1 %v3592_v26 }
 0x21c   :  { %2145 = vmatprep.subr.bf16.mxu1 %v3681_v2 }
 0x21d   :  { %2314 = vmatpush1.bf16.msra.mxu0 %v3593_v28  ;;  %v3631_v28 = vld [vmem:[%s4742_s4 + $0x620] sm:$0xff]  }
 0x21e   :  { %2315 = vmatprep.subr.bf16.mxu0 %v3681_v2 }
 0x21f   :  { %2146 = vmatpush1.bf16.msra.mxu1 %v3594_v29  ;;  %v3632_v29 = vld [vmem:[%s4742_s4 + $0x5a8] sm:$0xff]  }
 0x220   :  { %v1000_v32 = vpop.f32.mrf.mxu0  ;;  %2147 = vmatprep.subr.bf16.mxu1 %v3681_v2 }
 0x221   :  { %2316 = vmatpush1.bf16.msra.mxu0 %v3595_v30  ;;  %v3633_v30 = vld [vmem:[%s4742_s4 + $0x618] sm:$0xff]  }
 0x222   :  { %v832_v34 = vpop.f32.mrf.mxu1  ;;  %v1002_v35 = vpop.f32.mrf.mxu0  ;;  %2317 = vmatprep.subr.bf16.mxu0 %v3681_v2 }
 0x223   :  { %v838_v36 = vadd.f32 %v832_v34, %v4381_v51  ;;  %2148 = vmatpush1.bf16.msra.mxu1 %v3596_v31  ;;  %v3610_v51 = vld [vmem:[%s4742_s4 + $0x510] sm:$0xff]   ;;  %v3634_v31 = vld [vmem:[%s4742_s4 + $0x5a0] sm:$0xff]   ;;  %v3638_v35 = vld [vmem:[%s4742_s4 + $0x608] sm:$0xff]  }
 0x224   :  { %v834_v38 = vpop.f32.mrf.mxu1  ;;  %v1003_v39 = vpop.f32.mrf.mxu0  ;;  %2149 = vmatprep.subr.bf16.mxu1 %v3681_v2  ;;  %v3637_v34 = vld [vmem:[%s4742_s4 + $0x680] sm:$0xff]  }
 0x225   :  { %2318 = vmatpush1.bf16.msra.mxu0 %v3597_v33  ;;  %v4517_v41 = vadd.f32 %v1000_v32, %v838_v36  ;;  %v3635_v32 = vld [vmem:[%s4742_s4 + $0x688] sm:$0xff]   ;;  %v3636_v33 = vld [vmem:[%s4742_s4 + $0x610] sm:$0xff]   ;;  %v3639_v36 = vld [vmem:[%s4742_s4 + $0x678] sm:$0xff]  }
 0x226   :  { %v835_v42 = vpop.f32.mrf.mxu1  ;;  %v1004_v1 = vpop.f32.mrf.mxu0  ;;  %2319 = vmatprep.subr.bf16.mxu0 %v3681_v2  ;;  %v3641_v38 = vld [vmem:[%s4742_s4 + $0x670] sm:$0xff]   ;;  %v3642_v39 = vld [vmem:[%s4742_s4 + $0x5f8] sm:$0xff]  }
 0x227   :  { %2150 = vmatpush1.bf16.msra.mxu1 %v3598_v37  ;;  %v3640_v37 = vld [vmem:[%s4742_s4 + $0x600] sm:$0xff]   ;;  %v3646_v1 = vld [vmem:[%s4742_s4 + $0x5e8] sm:$0xff]  }
 0x228   :  { %v836_v43 = vpop.f32.mrf.mxu1  ;;  %2151 = vmatprep.subr.bf16.mxu1 %v3681_v2  ;;  %v3645_v42 = vld [vmem:[%s4742_s4 + $0x660] sm:$0xff]  }
 0x229   :  { %2320 = vmatpush1.bf16.msra.mxu0 %v3599_v40  ;;  %v3643_v40 = vld [vmem:[%s4742_s4 + $0x668] sm:$0xff]   ;;  %v3648_v43 = vld [vmem:[%s4742_s4 + $0x5e0] sm:$0xff]  }
 0x22a   :  { %2321 = vmatprep.subr.bf16.mxu0 %v3681_v2 }
 0x22b   :  { %2152 = vmatpush1.bf16.msra.mxu1 %v3600_v18  ;;  %v3647_v18 = vld [vmem:[%s4742_s4 + $0x658] sm:$0xff]  }
 0x22c   :  { %2153 = vmatprep.subr.bf16.mxu1 %v3681_v2 }
 0x22d   :  { %2322 = vmatpush1.bf16.msra.mxu0 %v3601_v56  ;;  %v2549_v56 = vrot.slane %v3960_v54, 5 }
 0x22e   :  { %2323 = vmatprep.subr.bf16.mxu0 %v3681_v2 }
 0x22f   :  { %2154 = vmatpush1.bf16.msra.mxu1 %v3602_v44  ;;  %v2381_v44 = vrot.slane %v3960_v54, 4 }
 0x230   :  { %2155 = vmatprep.subr.bf16.mxu1 %v3681_v2 }
 0x231   :  { %2324 = vmatpush1.bf16.msra.mxu0 %v3603_v45 }
 0x232   :  { %2327 = vmatprep.subr.bf16.mxu0 %v3681_v2 }
 0x233   :  { %2156 = vmatpush1.bf16.msra.mxu1 %v3604_v46 }
 0x234   :  { %2159 = vmatprep.subr.bf16.mxu1 %v3681_v2 }
 0x235   :  { %2328 = vmatpush2.bf16.msra.mxu0 %v3605_v10 }
 0x236   :  { %2329 = vmatprep.subr.bf16.mxu0 %v3681_v2 }
 0x237   :  { %2160 = vmatpush2.bf16.msra.mxu1 %v3606_v47 }
 0x238   :  { %2161 = vmatprep.subr.bf16.mxu1 %v3681_v2 }
 0x239   :  { %2330 = vmatpush2.bf16.msra.mxu0 %v3607_v27 }
 0x23a   :  { %2331 = vmatprep.subr.bf16.mxu0 %v3681_v2 }
 0x23b   :  { %2162 = vmatpush2.bf16.msra.mxu1 %v3608_v48 }
 0x23c   :  { %2163 = vmatprep.subr.bf16.mxu1 %v3681_v2 }
 0x23d   :  { %2332 = vmatpush2.bf16.msra.mxu0 %v3609_v49 }
 0x23e   :  { %2333 = vmatprep.subr.bf16.mxu0 %v3681_v2 }
 0x23f   :  { %2164 = vmatpush2.bf16.msra.mxu1 %v3610_v51 }
 0x240   :  { %2165 = vmatprep.subr.bf16.mxu1 %v3681_v2 }
 0x241   :  { %2334 = vmatpush2.bf16.msra.mxu0 %v3611_v52 }
 0x242   :  { %2335 = vmatprep.subr.bf16.mxu0 %v3681_v2 }
 0x243   :  { %2166 = vmatpush2.bf16.msra.mxu1 %v3612_v55 }
 0x244   :  { %2167 = vmatprep.subr.bf16.mxu1 %v3681_v2 }
 0x245   :  { %2336 = vmatpush2.bf16.msra.mxu0 %v3613_v50  ;;  %v3683_v50 = vmov 0.0  }
 0x246   :  { %2337 = vmatprep.subr.bf16.mxu0 %v3681_v2 }
 0x247   :  { %2168 = vmatpush2.bf16.msra.mxu1 %v3614_v58 }
 0x248   :  { %2169 = vmatprep.subr.bf16.mxu1 %v3681_v2 }
 0x249   :  { %2338 = vmatpush2.bf16.msra.mxu0 %v3615_v59  ;;  %v3650_v59 = vld [vmem:[%s4743_s5] sm:$0xff]  }
 0x24a   :  { %2339 = vmatprep.subr.bf16.mxu0 %v3681_v2 }
 0x24b   :  { %2170 = vmatpush2.bf16.msra.mxu1 %v3616_v60 }
 0x24c   :  { %2171 = vmatprep.subr.bf16.mxu1 %v3681_v2 }
 0x24d   :  { %2340 = vmatpush2.bf16.msra.mxu0 %v3617_v61 }
 0x24e   :  { %2645 = vmatprep.subr.bf16.mxu0 %v3681_v2 }
 0x24f   :  { %2172 = vmatpush2.bf16.msra.mxu1 %v3618_v62 }
 0x250   :  { %2342 = vmatmul.mubr.bf16.vlgmr.msra.gmra.mxu0 %v2213_v0  ;;  %2477 = vmatprep.subr.bf16.mxu1 %v3681_v2 }
 0x251   :  { %2646 = vmatpush1.bf16.msra.mxu0 %v3619_v63  ;;  %3398 = vmatprep.mubr.msk.bf16.mxu0 %vm206_vm5, %v2550_v3 }
 0x252   :  { %2174 = vmatmul.mubr.bf16.vlgmr.msra.gmra.mxu1 %v2045_v5  ;;  %2647 = vmatprep.subr.bf16.mxu0 %v3681_v2 }
 0x253   :  { %2478 = vmatpush1.bf16.msra.mxu1 %v3620_v4  ;;  %3352 = vmatprep.mubr.msk.bf16.mxu1 %vm206_vm5, %v2382_v6 }
 0x254   :  { %2479 = vmatprep.subr.bf16.mxu1 %v3681_v2 }
 0x255   :  { %2648 = vmatpush1.bf16.msra.mxu0 %v3621_v7 }
 0x256   :  { %2649 = vmatprep.subr.bf16.mxu0 %v3681_v2 }
 0x257   :  { %2480 = vmatpush1.bf16.msra.mxu1 %v3622_v8 }
 0x258   :  { %2481 = vmatprep.subr.bf16.mxu1 %v3681_v2 }
 0x259   :  { %2650 = vmatpush1.bf16.msra.mxu0 %v3623_v53 }
 0x25a   :  { %2651 = vmatprep.subr.bf16.mxu0 %v3681_v2 }
 0x25b   :  { %2482 = vmatpush1.bf16.msra.mxu1 %v3624_v9 }
 0x25c   :  { %v1336_v57 = vpop.f32.mrf.mxu0  ;;  %2483 = vmatprep.subr.bf16.mxu1 %v3681_v2 }
 0x25d   :  { %2652 = vmatpush1.bf16.msra.mxu0 %v3625_v11 }
 0x25e   :  { %v1168_v14 = vpop.f32.mrf.mxu1  ;;  %v1338_v15 = vpop.f32.mrf.mxu0  ;;  %2653 = vmatprep.subr.bf16.mxu0 %v3681_v2 }
 0x25f   :  { %v1174_v16 = vadd.f32 %v1168_v14, %v4517_v41  ;;  %2484 = vmatpush1.bf16.msra.mxu1 %v3626_v12  ;;  %v3644_v41 = vld [vmem:[%s4742_s4 + $0x5f0] sm:$0xff]  }
 0x260   :  { %v1170_v19 = vpop.f32.mrf.mxu1  ;;  %v1339_v20 = vpop.f32.mrf.mxu0  ;;  %2485 = vmatprep.subr.bf16.mxu1 %v3681_v2 }
 0x261   :  { %2654 = vmatpush1.bf16.msra.mxu0 %v3627_v13  ;;  %v4646_v22 = vadd.f32 %v1336_v57, %v1174_v16 }
 0x262   :  { %v1171_v23 = vpop.f32.mrf.mxu1  ;;  %v1340_v24 = vpop.f32.mrf.mxu0  ;;  %2655 = vmatprep.subr.bf16.mxu0 %v3681_v2 }
 0x263   :  { %2486 = vmatpush1.bf16.msra.mxu1 %v3628_v17 }
 0x264   :  { %v1172_v26 = vpop.f32.mrf.mxu1  ;;  %2487 = vmatprep.subr.bf16.mxu1 %v3681_v2 }
 0x265   :  { %2656 = vmatpush1.bf16.msra.mxu0 %v3629_v21 }
 0x266   :  { %2657 = vmatprep.subr.bf16.mxu0 %v3681_v2 }
 0x267   :  { %2488 = vmatpush1.bf16.msra.mxu1 %v3630_v25 }
 0x268   :  { %2489 = vmatprep.subr.bf16.mxu1 %v3681_v2 }
 0x269   :  { %2658 = vmatpush1.bf16.msra.mxu0 %v3631_v28 }
 0x26a   :  { %2659 = vmatprep.subr.bf16.mxu0 %v3681_v2 }
 0x26b   :  { %2490 = vmatpush1.bf16.msra.mxu1 %v3632_v29 }
 0x26c   :  { %2491 = vmatprep.subr.bf16.mxu1 %v3681_v2 }
 0x26d   :  { %2660 = vmatpush1.bf16.msra.mxu0 %v3633_v30 }
 0x26e   :  { %2663 = vmatprep.subr.bf16.mxu0 %v3681_v2 }
 0x26f   :  { %2492 = vmatpush1.bf16.msra.mxu1 %v3634_v31 }
 0x270   :  { %2495 = vmatprep.subr.bf16.mxu1 %v3681_v2 }
 0x271   :  { %2664 = vmatpush2.bf16.msra.mxu0 %v3635_v32 }
 0x272   :  { %2665 = vmatprep.subr.bf16.mxu0 %v3681_v2 }
 0x273   :  { %2496 = vmatpush2.bf16.msra.mxu1 %v3636_v33 }
 0x274   :  { %2497 = vmatprep.subr.bf16.mxu1 %v3681_v2 }
 0x275   :  { %2666 = vmatpush2.bf16.msra.mxu0 %v3637_v34 }
 0x276   :  { %2667 = vmatprep.subr.bf16.mxu0 %v3681_v2 }
 0x277   :  { %2498 = vmatpush2.bf16.msra.mxu1 %v3638_v35 }
 0x278   :  { %2499 = vmatprep.subr.bf16.mxu1 %v3681_v2 }
 0x279   :  { %2668 = vmatpush2.bf16.msra.mxu0 %v3639_v36 }
 0x27a   :  { %2669 = vmatprep.subr.bf16.mxu0 %v3681_v2 }
 0x27b   :  { %2500 = vmatpush2.bf16.msra.mxu1 %v3640_v37 }
 0x27c   :  { %2501 = vmatprep.subr.bf16.mxu1 %v3681_v2 }
 0x27d   :  { %2670 = vmatpush2.bf16.msra.mxu0 %v3641_v38 }
 0x27e   :  { %2671 = vmatprep.subr.bf16.mxu0 %v3681_v2 }
 0x27f   :  { %2502 = vmatpush2.bf16.msra.mxu1 %v3642_v39 }
 0x280   :  { %2503 = vmatprep.subr.bf16.mxu1 %v3681_v2 }
 0x281   :  { %2672 = vmatpush2.bf16.msra.mxu0 %v3643_v40 }
 0x282   :  { %2673 = vmatprep.subr.bf16.mxu0 %v3681_v2 }
 0x283   :  { %2504 = vmatpush2.bf16.msra.mxu1 %v3644_v41 }
 0x284   :  { %2505 = vmatprep.subr.bf16.mxu1 %v3681_v2 }
 0x285   :  { %2674 = vmatpush2.bf16.msra.mxu0 %v3645_v42 }
 0x286   :  { %2675 = vmatprep.subr.bf16.mxu0 %v3681_v2 }
 0x287   :  { %2506 = vmatpush2.bf16.msra.mxu1 %v3646_v1 }
 0x288   :  { %2507 = vmatprep.subr.bf16.mxu1 %v3681_v2  ;;  %v3649_v2 = vld [vmem:[%s4743_s5 + $0x8] ss:$0 sps:$4 sm:$0xff]   ;;  %s3685_s5 = smov [#allocation2]  }
 0x289   :  { %2676 = vmatpush2.bf16.msra.mxu0 %v3647_v18  ;;  %v2705_v54 = vsel %vm197_vm7, %v3649_v2, 0  ;;  %s2761_s9 = sshll.u32 %s3685_s5, 4  ;;  %s2762_s9 = int_to_ptr.vmem [resolvable:$true] %s2761_s9 }
 0x28a   :  { %s3659_s3 = scalar_lea.vmem %s2762_s9, 32  ;;  %p3664_p1 = scmp.lt.s32.totalorder %s2762_s9, %s2762_s9 }
 0x28b   :  { %2508 = vmatpush2.bf16.msra.mxu1 %v3648_v43  ;;  %p3660_p0 = scmp.ne.s32.totalorder %s2762_s9, %s3659_s3  ;;  %p3665_p2 = scmp.lt.s32.totalorder %s3659_s3, %s3659_s3 }
 0x28c   :  { %2678 = vmatmul.mubr.bf16.vlgmr.msra.gmra.mxu0 %v2549_v56  ;;  %3406 = vmatprep.subr.bf16.mxu1 %v3683_v50 }
 0x28d   :  { %p3666_p3 = por %p3665_p2, %p3664_p1 }
 0x28e   :  { %2510 = vmatmul.mubr.bf16.vlgmr.msra.gmra.mxu1 %v2381_v44 }
 0x28f   :  { %3407 = vmatpush3.bf16.msra.mxu1 %v2705_v54  ;;  %3410 = vmatprep.mubr.msk.bf16.mxu1 %vm3684_vm12, %v3683_v50  ;;  %p3667_p4 = pnand %p3666_p3, %p3660_p0 }
 0x290   :  { %3408 = vmatprep.subr.bf16.mxu1 %v3683_v50 }
 0x293   :  { %3409 = vmatpush3.bf16.msra.mxu1 %v3650_v59 }
 0x298   :  { %v1672_v45 = vpop.f32.mrf.mxu0 }
 0x29a   :  { %v1504_v46 = vpop.f32.mrf.mxu1  ;;  %v1674_v10 = vpop.f32.mrf.mxu0 }
 0x29b   :  { %v1510_v47 = vadd.f32 %v1504_v46, %v4646_v22 }
 0x29c   :  { %v1506_v27 = vpop.f32.mrf.mxu1  ;;  %v1675_v48 = vpop.f32.mrf.mxu0 }
 0x29d   :  { %v1678_v49 = vadd.f32 %v1672_v45, %v1510_v47 }
 0x29e   :  { %v1507_v51 = vpop.f32.mrf.mxu1  ;;  %v1676_v52 = vpop.f32.mrf.mxu0 }
 0x2a0   :  { %v1508_v55 = vpop.f32.mrf.mxu1 }
 0x2d4   :  { %v2007_v58 = vpop.f32.mrf.mxu0 }
 0x2d6   :  { %v1837_v60 = vpop.f32.mrf.mxu1  ;;  %v2009_v61 = vpop.f32.mrf.mxu0 }
 0x2d7   :  { %v1843_v62 = vadd.f32 %v1837_v60, %v1678_v49 }
 0x2d8   :  { %v1839_v63 = vpop.f32.mrf.mxu1  ;;  %v2010_v0 = vpop.f32.mrf.mxu0 }
 0x2d9   :  { %v2013_v3 = vadd.f32 %v2007_v58, %v1843_v62 }
 0x2da   :  { %v1840_v4 = vpop.f32.mrf.mxu1  ;;  %v2011_v5 = vpop.f32.mrf.mxu0 }
 0x2dc   :  { %v1841_v6 = vpop.f32.mrf.mxu1 }
 0x310   :  { %v2343_v7 = vpop.f32.mrf.mxu0 }
 0x312   :  { %v2175_v8 = vpop.f32.mrf.mxu1  ;;  %v2345_v53 = vpop.f32.mrf.mxu0 }
 0x313   :  { %v2181_v14 = vadd.f32 %v2175_v8, %v2013_v3 }
 0x314   :  { %v2177_v9 = vpop.f32.mrf.mxu1  ;;  %v2346_v11 = vpop.f32.mrf.mxu0 }
 0x315   :  { %v2349_v16 = vadd.f32 %v2343_v7, %v2181_v14 }
 0x316   :  { %v2178_v12 = vpop.f32.mrf.mxu1  ;;  %v2347_v57 = vpop.f32.mrf.mxu0 }
 0x318   :  { %v2179_v13 = vpop.f32.mrf.mxu1 }
 0x34c   :  { %v2679_v15 = vpop.f32.mrf.mxu0 }
 0x34e   :  { %v2511_v17 = vpop.f32.mrf.mxu1  ;;  %v2681_v19 = vpop.f32.mrf.mxu0 }
 0x34f   :  { %v2517_v20 = vadd.f32 %v2511_v17, %v2349_v16 }
 0x350   :  { %v2513_v21 = vpop.f32.mrf.mxu1  ;;  %v2682_v22 = vpop.f32.mrf.mxu0 }
 0x351   :  { %v2685_v23 = vadd.f32 %v2679_v15, %v2517_v20 }
 0x352   :  { %v2514_v24 = vpop.f32.mrf.mxu1  ;;  %v2683_v25 = vpop.f32.mrf.mxu0 }
 0x353   :  { %v2686_v26 = vmax.f32 %v2685_v23, 0.0 }
 0x354   :  { %v2515_v28 = vpop.f32.mrf.mxu1 }
 0x355   :  { %v2687_v29 = vpack.c.bf16 %v2686_v26, %v2686_v26 }
 0x357   :  { %3411 = vmatmul.mubr.msk.bf16.vlgmr.msra.gmra.mxu1 %vm2700_vm13, %v2687_v29 }
 0x417   :  { %v2741_v30 = vpop.f32.mrf.mxu1 }
 0x418   :  { %v3402_v31 = vmul.f32 -1.442695, %v2741_v30 }
 0x419   :  { %v3412_v32 = vpop.f32.mrf.mxu1 }
 0x41a   :  { %3655 = vpow2.f32 %v3402_v31 }
 0x41b   :  { %v2744_v33 = vpop.f32.mrf.mxu1 }
 0x41d   :  { %v3413_v34 = vpop.f32.mrf.mxu1 }
 0x427   :  { %v3656_v35 = vpop.eup %3655 }
 0x428   :  { %v2750_v36 = vadd.f32 1.0, %v3656_v35 }
 0x42a   :  { %3657 = vrcp.f32 %v2750_v36 }
 0x437   :  { %v3658_v37 = vpop.eup %3657 }
 0x438   :  { %2754 = vst.msk [vmem:[#allocation2] sm:$0x3] %vm2753_vm14, %v3658_v37 }
 0x439   :  { %3670 = shalt.err (!%p3667_p4)
}
 0x43a   :  { %2764 = dma.vmem_to_hbm [thread:$0]  %s2762_s9, 32, %s4744_s6, [#allocation3]  }
 0x43b   :  { %3679 = dma.done.wait [#allocation3], 32  }
 0x43c   :  { %3680 = vsyncadd [#allocation3], 4294967264 }
 0x43d   :  { %2768 = vsyncpa [#allocation3], 1 }

</bundles_post_ra>
